<compile_context>
chip_gen: v7x
topology: tpu7x:2x2x1
jax: 0.10.0
libtpu: 0.0.40
codegen_flags: <defaults>
</compile_context>

<pallas_src>
import functools

import jax
import jax.numpy as jnp
from jax import lax
from jax.experimental import pallas as pl
from jax.experimental.pallas import tpu as pltpu


def _convblock_kernel(x_ref, w_ref, b_ref, m_ref, o_ref, xp_ref, *,
                      C_in, C_out, H, W, P, use_mxu):
    """One batch element: out = relu(conv3x3(x) + b), all in (C, H*W) layout."""
    HW = H * W

    # Build the zero-haloed, flattened image in VMEM scratch: [P zeros | x | P zeros].
    zpad = jnp.zeros((C_in, P), dtype=xp_ref.dtype)
    xp_ref[:, 0:P] = zpad
    xp_ref[:, P + HW:P + HW + P] = zpad
    xp_ref[:, P:P + HW] = x_ref[0]

    left_mask = m_ref[0:1, :]    # 0 where output column w == 0
    right_mask = m_ref[1:2, :]   # 0 where output column w == W-1

    acc = jnp.zeros((C_out, HW), dtype=jnp.float32)
    for r in (-1, 0, 1):          # vertical tap offset
        for c in (-1, 0, 1):      # horizontal tap offset
            k = (r + 1) * 3 + (c + 1)
            off = P + r * W + c   # constant flat offset of this tap
            xs = xp_ref[:, off:off + HW]          # (C_in, HW)
            if c == -1:
                xs = xs * left_mask
            elif c == 1:
                xs = xs * right_mask
            wk = w_ref[k]                         # (C_out, C_in)
            if use_mxu:
                acc = acc + jnp.dot(wk, xs, preferred_element_type=jnp.float32)
            else:
                # Tiny channels: VPU broadcast-FMA path (MXU would be pure latency).
                xs32 = xs.astype(jnp.float32)
                wk32 = wk.astype(jnp.float32)
                for ci in range(C_in):
                    acc = acc + wk32[:, ci:ci + 1] * xs32[ci:ci + 1, :]

    y = jnp.maximum(acc + b_ref[...], 0.0)        # bias (f32) + ReLU
    o_ref[...] = y.astype(o_ref.dtype)[None]      # lane-dense (1, C_out, HW) store


def convblock_forward(x, weight, bias):
    """Equivalent of ConvBlock.forward with default args (3x3, stride 1, pad 1, ReLU).

    x:      (N, C_in, H, W)
    weight: (C_out, C_in, 3, 3)
    bias:   (C_out,)
    returns (N, C_out, H, W)
    """
    N, C_in, H, W = x.shape
    C_out = weight.shape[0]
    assert weight.shape == (C_out, C_in, 3, 3)
    HW = H * W
    # Halo padding in flattened row-major space, rounded to a lane multiple so the
    # big center copy into scratch is lane-aligned.  Needs P >= W + 1.
    P = 128 * ((W + 1 + 127) // 128)

    x_flat = x.reshape(N, C_in, HW)                       # free reshape, no transpose
    w_taps = jnp.transpose(weight, (2, 3, 0, 1)).reshape(9, C_out, C_in)
    b2 = bias.astype(jnp.float32).reshape(C_out, 1)

    col = jnp.arange(HW, dtype=jnp.int32) % W
    masks = jnp.stack([(col != 0), (col != W - 1)]).astype(x.dtype)   # (2, HW)

    use_mxu = (C_in > 8) or (C_out > 8)

    kernel = functools.partial(_convblock_kernel, C_in=C_in, C_out=C_out,
                               H=H, W=W, P=P, use_mxu=use_mxu)

    flops = 2 * N * HW * C_in * C_out * 9 + 2 * N * C_out * HW
    bytes_accessed = 4 * (N * C_in * HW + N * C_out * HW
                          + 9 * C_out * C_in + C_out + 2 * HW)

    out_flat = pl.pallas_call(
        kernel,
        out_shape=jax.ShapeDtypeStruct((N, C_out, HW), x.dtype),
        grid_spec=pltpu.PrefetchScalarGridSpec(
            num_scalar_prefetch=0,
            grid=(N,),
            in_specs=[
                pl.BlockSpec((1, C_in, HW), lambda n: (n, 0, 0)),      # streamed x
                pl.BlockSpec((9, C_out, C_in), lambda n: (0, 0, 0)),   # resident W
                pl.BlockSpec((C_out, 1), lambda n: (0, 0)),            # resident bias
                pl.BlockSpec((2, HW), lambda n: (0, 0)),               # resident masks
            ],
            out_specs=pl.BlockSpec((1, C_out, HW), lambda n: (n, 0, 0)),
            scratch_shapes=[pltpu.VMEM((C_in, HW + 2 * P), x.dtype)],
        ),
        compiler_params=pltpu.CompilerParams(
            dimension_semantics=("parallel",)),
        cost_estimate=pl.CostEstimate(flops=flops, transcendentals=0,
                                      bytes_accessed=bytes_accessed),
    )(x_flat, w_taps, b2, masks)

    return out_flat.reshape(N, C_out, H, W)               # free reshape, no transpose


if __name__ == "__main__":
    key = jax.random.PRNGKey(0)

    def run_case(N, C_in, C_out, H, W, k):
        kx, kw, kb = jax.random.split(k, 3)
        x = jax.random.normal(kx, (N, C_in, H, W), dtype=jnp.float32)
        # PyTorch Conv2d default init: U[-1/sqrt(fan_in), 1/sqrt(fan_in)], fan_in = C_in*3*3.
        bound = 1.0 / jnp.sqrt(float(C_in * 9))
        weight = jax.random.uniform(kw, (C_out, C_in, 3, 3),
                                    minval=-bound, maxval=bound, dtype=jnp.float32)
        bias = jax.random.uniform(kb, (C_out,),
                                  minval=-bound, maxval=bound, dtype=jnp.float32)

        out = convblock_forward(x, weight, bias)
        jax.block_until_ready(out)

        ref = lax.conv_general_dilated(
            x, weight, window_strides=(1, 1), padding=((1, 1), (1, 1)),
            dimension_numbers=("NCHW", "OIHW", "NCHW"),
            precision=lax.Precision.HIGHEST)
        ref = jnp.maximum(ref + bias[None, :, None, None], 0.0)

        assert out.shape == (N, C_out, H, W)
        assert jnp.allclose(out, ref, atol=1e-2, rtol=1e-2), \
            float(jnp.max(jnp.abs(out - ref)))

    k1, k2 = jax.random.split(key)
    run_case(2, 4, 8, 16, 16, k1)    # tiny channels -> VPU FMA path
    run_case(1, 32, 32, 8, 8, k2)    # larger channels -> MXU dot path

    print("KERNEL_OK")
</pallas_src>

<mosaic_0001>
module attributes {stable_mosaic.version = 11 : i64} {
  func.func @_convblock_kernel(%arg0: i32, %arg1: memref<1x4x256xf32, #tpu.memory_space<vmem>>, %arg2: memref<9x8x4xf32, #tpu.memory_space<vmem>>, %arg3: memref<8x1xf32, #tpu.memory_space<vmem>>, %arg4: memref<2x256xf32, #tpu.memory_space<vmem>>, %arg5: memref<1x8x256xf32, #tpu.memory_space<vmem>>, %arg6: memref<4x512xf32, #tpu.memory_space<vmem>>) attributes {dimension_semantics = [#tpu.dimension_semantics<parallel>], iteration_bounds = array<i64: 2>, scalar_prefetch = 0 : i64, scratch_operands = 1 : i64, tpu.core_type = #tpu.core_type<tc>, window_params = [{transform_indices = @transform_0, window_bounds = array<i64: 1, 4, 256>}, {pipeline_mode = #tpu.pipeline_mode<synchronous>, transform_indices = @transform_1, window_bounds = array<i64: 9, 8, 4>}, {pipeline_mode = #tpu.pipeline_mode<synchronous>, transform_indices = @transform_2, window_bounds = array<i64: 8, 1>}, {pipeline_mode = #tpu.pipeline_mode<synchronous>, transform_indices = @transform_3, window_bounds = array<i64: 2, 256>}, {transform_indices = @transform_4, window_bounds = array<i64: 1, 8, 256>}]} {
    %cst = arith.constant 0.000000e+00 : f32
    %0 = vector.broadcast %cst : f32 to vector<4x128xf32>
    %c0 = arith.constant 0 : index
    %c0_0 = arith.constant 0 : index
    %1 = vector.load %arg6[%c0, %c0_0] : memref<4x512xf32, #tpu.memory_space<vmem>>, vector<4x128xf32>
    tpu.vector_store %arg6[%c0, %c0_0], %0 {strides = array<i32>} : memref<4x512xf32, #tpu.memory_space<vmem>>, vector<4x128xf32>,
    %c0_1 = arith.constant 0 : index
    %c384 = arith.constant 384 : index
    %2 = vector.load %arg6[%c0_1, %c384] : memref<4x512xf32, #tpu.memory_space<vmem>>, vector<4x128xf32>
    tpu.vector_store %arg6[%c0_1, %c384], %0 {strides = array<i32>} : memref<4x512xf32, #tpu.memory_space<vmem>>, vector<4x128xf32>,
    %c0_2 = arith.constant 0 : index
    %c0_3 = arith.constant 0 : index
    %c0_4 = arith.constant 0 : index
    %3 = vector.load %arg1[%c0_2, %c0_3, %c0_4] : memref<1x4x256xf32, #tpu.memory_space<vmem>>, vector<1x4x256xf32>
    %4 = vector.shape_cast %3 : vector<1x4x256xf32> to vector<4x256xf32>
    %c0_5 = arith.constant 0 : index
    %c128 = arith.constant 128 : index
    %5 = vector.load %arg6[%c0_5, %c128] : memref<4x512xf32, #tpu.memory_space<vmem>>, vector<4x256xf32>
    tpu.vector_store %arg6[%c0_5, %c128], %4 {strides = array<i32>} : memref<4x512xf32, #tpu.memory_space<vmem>>, vector<4x256xf32>,
    %c0_6 = arith.constant 0 : index
    %c0_7 = arith.constant 0 : index
    %6 = vector.load %arg4[%c0_6, %c0_7] : memref<2x256xf32, #tpu.memory_space<vmem>>, vector<1x256xf32>
    %c1 = arith.constant 1 : index
    %c0_8 = arith.constant 0 : index
    %7 = vector.load %arg4[%c1, %c0_8] : memref<2x256xf32, #tpu.memory_space<vmem>>, vector<1x256xf32>
    %cst_9 = arith.constant 0.000000e+00 : f32
    %8 = vector.broadcast %cst_9 : f32 to vector<8x256xf32>
    %c0_10 = arith.constant 0 : index
    %c111 = arith.constant 111 : index
    %9 = vector.load %arg6[%c0_10, %c111] : memref<4x512xf32, #tpu.memory_space<vmem>>, vector<4x256xf32>
    %10 = vector.broadcast %6 : vector<1x256xf32> to vector<4x256xf32>
    %11 = arith.mulf %9, %10 : vector<4x256xf32>
    %c0_11 = arith.constant 0 : index
    %c0_12 = arith.constant 0 : index
    %c0_13 = arith.constant 0 : index
    %12 = vector.load %arg2[%c0_11, %c0_12, %c0_13] : memref<9x8x4xf32, #tpu.memory_space<vmem>>, vector<1x8x4xf32>
    %13 = vector.shape_cast %12 : vector<1x8x4xf32> to vector<8x4xf32>
    %14 = vector.extract_strided_slice %13 {offsets = [0, 0], sizes = [8, 1], strides = [1, 1]} : vector<8x4xf32> to vector<8x1xf32>
    %15 = vector.extract_strided_slice %11 {offsets = [0, 0], sizes = [1, 256], strides = [1, 1]} : vector<4x256xf32> to vector<1x256xf32>
    %16 = vector.broadcast %14 : vector<8x1xf32> to vector<8x256xf32>
    %17 = vector.broadcast %15 : vector<1x256xf32> to vector<8x256xf32>
    %18 = arith.mulf %16, %17 : vector<8x256xf32>
    %19 = arith.addf %8, %18 : vector<8x256xf32>
    %20 = vector.extract_strided_slice %13 {offsets = [0, 1], sizes = [8, 1], strides = [1, 1]} : vector<8x4xf32> to vector<8x1xf32>
    %21 = vector.extract_strided_slice %11 {offsets = [1, 0], sizes = [1, 256], strides = [1, 1]} : vector<4x256xf32> to vector<1x256xf32>
    %22 = vector.broadcast %20 : vector<8x1xf32> to vector<8x256xf32>
    %23 = vector.broadcast %21 : vector<1x256xf32> to vector<8x256xf32>
    %24 = arith.mulf %22, %23 : vector<8x256xf32>
    %25 = arith.addf %19, %24 : vector<8x256xf32>
    %26 = vector.extract_strided_slice %13 {offsets = [0, 2], sizes = [8, 1], strides = [1, 1]} : vector<8x4xf32> to vector<8x1xf32>
    %27 = vector.extract_strided_slice %11 {offsets = [2, 0], sizes = [1, 256], strides = [1, 1]} : vector<4x256xf32> to vector<1x256xf32>
    %28 = vector.broadcast %26 : vector<8x1xf32> to vector<8x256xf32>
    %29 = vector.broadcast %27 : vector<1x256xf32> to vector<8x256xf32>
    %30 = arith.mulf %28, %29 : vector<8x256xf32>
    %31 = arith.addf %25, %30 : vector<8x256xf32>
    %32 = vector.extract_strided_slice %13 {offsets = [0, 3], sizes = [8, 1], strides = [1, 1]} : vector<8x4xf32> to vector<8x1xf32>
    %33 = vector.extract_strided_slice %11 {offsets = [3, 0], sizes = [1, 256], strides = [1, 1]} : vector<4x256xf32> to vector<1x256xf32>
    %34 = vector.broadcast %32 : vector<8x1xf32> to vector<8x256xf32>
    %35 = vector.broadcast %33 : vector<1x256xf32> to vector<8x256xf32>
    %36 = arith.mulf %34, %35 : vector<8x256xf32>
    %37 = arith.addf %31, %36 : vector<8x256xf32>
    %c0_14 = arith.constant 0 : index
    %c112 = arith.constant 112 : index
    %38 = vector.load %arg6[%c0_14, %c112] : memref<4x512xf32, #tpu.memory_space<vmem>>, vector<4x256xf32>
    %c1_15 = arith.constant 1 : index
    %c0_16 = arith.constant 0 : index
    %c0_17 = arith.constant 0 : index
    %39 = vector.load %arg2[%c1_15, %c0_16, %c0_17] : memref<9x8x4xf32, #tpu.memory_space<vmem>>, vector<1x8x4xf32>
    %40 = vector.shape_cast %39 : vector<1x8x4xf32> to vector<8x4xf32>
    %41 = vector.extract_strided_slice %40 {offsets = [0, 0], sizes = [8, 1], strides = [1, 1]} : vector<8x4xf32> to vector<8x1xf32>
    %42 = vector.extract_strided_slice %38 {offsets = [0, 0], sizes = [1, 256], strides = [1, 1]} : vector<4x256xf32> to vector<1x256xf32>
    %43 = vector.broadcast %41 : vector<8x1xf32> to vector<8x256xf32>
    %44 = vector.broadcast %42 : vector<1x256xf32> to vector<8x256xf32>
    %45 = arith.mulf %43, %44 : vector<8x256xf32>
    %46 = arith.addf %37, %45 : vector<8x256xf32>
    %47 = vector.extract_strided_slice %40 {offsets = [0, 1], sizes = [8, 1], strides = [1, 1]} : vector<8x4xf32> to vector<8x1xf32>
    %48 = vector.extract_strided_slice %38 {offsets = [1, 0], sizes = [1, 256], strides = [1, 1]} : vector<4x256xf32> to vector<1x256xf32>
    %49 = vector.broadcast %47 : vector<8x1xf32> to vector<8x256xf32>
    %50 = vector.broadcast %48 : vector<1x256xf32> to vector<8x256xf32>
    %51 = arith.mulf %49, %50 : vector<8x256xf32>
    %52 = arith.addf %46, %51 : vector<8x256xf32>
    %53 = vector.extract_strided_slice %40 {offsets = [0, 2], sizes = [8, 1], strides = [1, 1]} : vector<8x4xf32> to vector<8x1xf32>
    %54 = vector.extract_strided_slice %38 {offsets = [2, 0], sizes = [1, 256], strides = [1, 1]} : vector<4x256xf32> to vector<1x256xf32>
    %55 = vector.broadcast %53 : vector<8x1xf32> to vector<8x256xf32>
    %56 = vector.broadcast %54 : vector<1x256xf32> to vector<8x256xf32>
    %57 = arith.mulf %55, %56 : vector<8x256xf32>
    %58 = arith.addf %52, %57 : vector<8x256xf32>
    %59 = vector.extract_strided_slice %40 {offsets = [0, 3], sizes = [8, 1], strides = [1, 1]} : vector<8x4xf32> to vector<8x1xf32>
    %60 = vector.extract_strided_slice %38 {offsets = [3, 0], sizes = [1, 256], strides = [1, 1]} : vector<4x256xf32> to vector<1x256xf32>
    %61 = vector.broadcast %59 : vector<8x1xf32> to vector<8x256xf32>
    %62 = vector.broadcast %60 : vector<1x256xf32> to vector<8x256xf32>
    %63 = arith.mulf %61, %62 : vector<8x256xf32>
    %64 = arith.addf %58, %63 : vector<8x256xf32>
    %c0_18 = arith.constant 0 : index
    %c113 = arith.constant 113 : index
    %65 = vector.load %arg6[%c0_18, %c113] : memref<4x512xf32, #tpu.memory_space<vmem>>, vector<4x256xf32>
    %66 = vector.broadcast %7 : vector<1x256xf32> to vector<4x256xf32>
    %67 = arith.mulf %65, %66 : vector<4x256xf32>
    %c2 = arith.constant 2 : index
    %c0_19 = arith.constant 0 : index
    %c0_20 = arith.constant 0 : index
    %68 = vector.load %arg2[%c2, %c0_19, %c0_20] : memref<9x8x4xf32, #tpu.memory_space<vmem>>, vector<1x8x4xf32>
    %69 = vector.shape_cast %68 : vector<1x8x4xf32> to vector<8x4xf32>
    %70 = vector.extract_strided_slice %69 {offsets = [0, 0], sizes = [8, 1], strides = [1, 1]} : vector<8x4xf32> to vector<8x1xf32>
    %71 = vector.extract_strided_slice %67 {offsets = [0, 0], sizes = [1, 256], strides = [1, 1]} : vector<4x256xf32> to vector<1x256xf32>
    %72 = vector.broadcast %70 : vector<8x1xf32> to vector<8x256xf32>
    %73 = vector.broadcast %71 : vector<1x256xf32> to vector<8x256xf32>
    %74 = arith.mulf %72, %73 : vector<8x256xf32>
    %75 = arith.addf %64, %74 : vector<8x256xf32>
    %76 = vector.extract_strided_slice %69 {offsets = [0, 1], sizes = [8, 1], strides = [1, 1]} : vector<8x4xf32> to vector<8x1xf32>
    %77 = vector.extract_strided_slice %67 {offsets = [1, 0], sizes = [1, 256], strides = [1, 1]} : vector<4x256xf32> to vector<1x256xf32>
    %78 = vector.broadcast %76 : vector<8x1xf32> to vector<8x256xf32>
    %79 = vector.broadcast %77 : vector<1x256xf32> to vector<8x256xf32>
    %80 = arith.mulf %78, %79 : vector<8x256xf32>
    %81 = arith.addf %75, %80 : vector<8x256xf32>
    %82 = vector.extract_strided_slice %69 {offsets = [0, 2], sizes = [8, 1], strides = [1, 1]} : vector<8x4xf32> to vector<8x1xf32>
    %83 = vector.extract_strided_slice %67 {offsets = [2, 0], sizes = [1, 256], strides = [1, 1]} : vector<4x256xf32> to vector<1x256xf32>
    %84 = vector.broadcast %82 : vector<8x1xf32> to vector<8x256xf32>
    %85 = vector.broadcast %83 : vector<1x256xf32> to vector<8x256xf32>
    %86 = arith.mulf %84, %85 : vector<8x256xf32>
    %87 = arith.addf %81, %86 : vector<8x256xf32>
    %88 = vector.extract_strided_slice %69 {offsets = [0, 3], sizes = [8, 1], strides = [1, 1]} : vector<8x4xf32> to vector<8x1xf32>
    %89 = vector.extract_strided_slice %67 {offsets = [3, 0], sizes = [1, 256], strides = [1, 1]} : vector<4x256xf32> to vector<1x256xf32>
    %90 = vector.broadcast %88 : vector<8x1xf32> to vector<8x256xf32>
    %91 = vector.broadcast %89 : vector<1x256xf32> to vector<8x256xf32>
    %92 = arith.mulf %90, %91 : vector<8x256xf32>
    %93 = arith.addf %87, %92 : vector<8x256xf32>
    %c0_21 = arith.constant 0 : index
    %c127 = arith.constant 127 : index
    %94 = vector.load %arg6[%c0_21, %c127] : memref<4x512xf32, #tpu.memory_space<vmem>>, vector<4x256xf32>
    %95 = vector.broadcast %6 : vector<1x256xf32> to vector<4x256xf32>
    %96 = arith.mulf %94, %95 : vector<4x256xf32>
    %c3 = arith.constant 3 : index
    %c0_22 = arith.constant 0 : index
    %c0_23 = arith.constant 0 : index
    %97 = vector.load %arg2[%c3, %c0_22, %c0_23] : memref<9x8x4xf32, #tpu.memory_space<vmem>>, vector<1x8x4xf32>
    %98 = vector.shape_cast %97 : vector<1x8x4xf32> to vector<8x4xf32>
    %99 = vector.extract_strided_slice %98 {offsets = [0, 0], sizes = [8, 1], strides = [1, 1]} : vector<8x4xf32> to vector<8x1xf32>
    %100 = vector.extract_strided_slice %96 {offsets = [0, 0], sizes = [1, 256], strides = [1, 1]} : vector<4x256xf32> to vector<1x256xf32>
    %101 = vector.broadcast %99 : vector<8x1xf32> to vector<8x256xf32>
    %102 = vector.broadcast %100 : vector<1x256xf32> to vector<8x256xf32>
    %103 = arith.mulf %101, %102 : vector<8x256xf32>
    %104 = arith.addf %93, %103 : vector<8x256xf32>
    %105 = vector.extract_strided_slice %98 {offsets = [0, 1], sizes = [8, 1], strides = [1, 1]} : vector<8x4xf32> to vector<8x1xf32>
    %106 = vector.extract_strided_slice %96 {offsets = [1, 0], sizes = [1, 256], strides = [1, 1]} : vector<4x256xf32> to vector<1x256xf32>
    %107 = vector.broadcast %105 : vector<8x1xf32> to vector<8x256xf32>
    %108 = vector.broadcast %106 : vector<1x256xf32> to vector<8x256xf32>
    %109 = arith.mulf %107, %108 : vector<8x256xf32>
    %110 = arith.addf %104, %109 : vector<8x256xf32>
    %111 = vector.extract_strided_slice %98 {offsets = [0, 2], sizes = [8, 1], strides = [1, 1]} : vector<8x4xf32> to vector<8x1xf32>
    %112 = vector.extract_strided_slice %96 {offsets = [2, 0], sizes = [1, 256], strides = [1, 1]} : vector<4x256xf32> to vector<1x256xf32>
    %113 = vector.broadcast %111 : vector<8x1xf32> to vector<8x256xf32>
    %114 = vector.broadcast %112 : vector<1x256xf32> to vector<8x256xf32>
    %115 = arith.mulf %113, %114 : vector<8x256xf32>
    %116 = arith.addf %110, %115 : vector<8x256xf32>
    %117 = vector.extract_strided_slice %98 {offsets = [0, 3], sizes = [8, 1], strides = [1, 1]} : vector<8x4xf32> to vector<8x1xf32>
    %118 = vector.extract_strided_slice %96 {offsets = [3, 0], sizes = [1, 256], strides = [1, 1]} : vector<4x256xf32> to vector<1x256xf32>
    %119 = vector.broadcast %117 : vector<8x1xf32> to vector<8x256xf32>
    %120 = vector.broadcast %118 : vector<1x256xf32> to vector<8x256xf32>
    %121 = arith.mulf %119, %120 : vector<8x256xf32>
    %122 = arith.addf %116, %121 : vector<8x256xf32>
    %c0_24 = arith.constant 0 : index
    %c128_25 = arith.constant 128 : index
    %123 = vector.load %arg6[%c0_24, %c128_25] : memref<4x512xf32, #tpu.memory_space<vmem>>, vector<4x256xf32>
    %c4 = arith.constant 4 : index
    %c0_26 = arith.constant 0 : index
    %c0_27 = arith.constant 0 : index
    %124 = vector.load %arg2[%c4, %c0_26, %c0_27] : memref<9x8x4xf32, #tpu.memory_space<vmem>>, vector<1x8x4xf32>
    %125 = vector.shape_cast %124 : vector<1x8x4xf32> to vector<8x4xf32>
    %126 = vector.extract_strided_slice %125 {offsets = [0, 0], sizes = [8, 1], strides = [1, 1]} : vector<8x4xf32> to vector<8x1xf32>
    %127 = vector.extract_strided_slice %123 {offsets = [0, 0], sizes = [1, 256], strides = [1, 1]} : vector<4x256xf32> to vector<1x256xf32>
    %128 = vector.broadcast %126 : vector<8x1xf32> to vector<8x256xf32>
    %129 = vector.broadcast %127 : vector<1x256xf32> to vector<8x256xf32>
    %130 = arith.mulf %128, %129 : vector<8x256xf32>
    %131 = arith.addf %122, %130 : vector<8x256xf32>
    %132 = vector.extract_strided_slice %125 {offsets = [0, 1], sizes = [8, 1], strides = [1, 1]} : vector<8x4xf32> to vector<8x1xf32>
    %133 = vector.extract_strided_slice %123 {offsets = [1, 0], sizes = [1, 256], strides = [1, 1]} : vector<4x256xf32> to vector<1x256xf32>
    %134 = vector.broadcast %132 : vector<8x1xf32> to vector<8x256xf32>
    %135 = vector.broadcast %133 : vector<1x256xf32> to vector<8x256xf32>
    %136 = arith.mulf %134, %135 : vector<8x256xf32>
    %137 = arith.addf %131, %136 : vector<8x256xf32>
    %138 = vector.extract_strided_slice %125 {offsets = [0, 2], sizes = [8, 1], strides = [1, 1]} : vector<8x4xf32> to vector<8x1xf32>
    %139 = vector.extract_strided_slice %123 {offsets = [2, 0], sizes = [1, 256], strides = [1, 1]} : vector<4x256xf32> to vector<1x256xf32>
    %140 = vector.broadcast %138 : vector<8x1xf32> to vector<8x256xf32>
    %141 = vector.broadcast %139 : vector<1x256xf32> to vector<8x256xf32>
    %142 = arith.mulf %140, %141 : vector<8x256xf32>
    %143 = arith.addf %137, %142 : vector<8x256xf32>
    %144 = vector.extract_strided_slice %125 {offsets = [0, 3], sizes = [8, 1], strides = [1, 1]} : vector<8x4xf32> to vector<8x1xf32>
    %145 = vector.extract_strided_slice %123 {offsets = [3, 0], sizes = [1, 256], strides = [1, 1]} : vector<4x256xf32> to vector<1x256xf32>
    %146 = vector.broadcast %144 : vector<8x1xf32> to vector<8x256xf32>
    %147 = vector.broadcast %145 : vector<1x256xf32> to vector<8x256xf32>
    %148 = arith.mulf %146, %147 : vector<8x256xf32>
    %149 = arith.addf %143, %148 : vector<8x256xf32>
    %c0_28 = arith.constant 0 : index
    %c129 = arith.constant 129 : index
    %150 = vector.load %arg6[%c0_28, %c129] : memref<4x512xf32, #tpu.memory_space<vmem>>, vector<4x256xf32>
    %151 = vector.broadcast %7 : vector<1x256xf32> to vector<4x256xf32>
    %152 = arith.mulf %150, %151 : vector<4x256xf32>
    %c5 = arith.constant 5 : index
    %c0_29 = arith.constant 0 : index
    %c0_30 = arith.constant 0 : index
    %153 = vector.load %arg2[%c5, %c0_29, %c0_30] : memref<9x8x4xf32, #tpu.memory_space<vmem>>, vector<1x8x4xf32>
    %154 = vector.shape_cast %153 : vector<1x8x4xf32> to vector<8x4xf32>
    %155 = vector.extract_strided_slice %154 {offsets = [0, 0], sizes = [8, 1], strides = [1, 1]} : vector<8x4xf32> to vector<8x1xf32>
    %156 = vector.extract_strided_slice %152 {offsets = [0, 0], sizes = [1, 256], strides = [1, 1]} : vector<4x256xf32> to vector<1x256xf32>
    %157 = vector.broadcast %155 : vector<8x1xf32> to vector<8x256xf32>
    %158 = vector.broadcast %156 : vector<1x256xf32> to vector<8x256xf32>
    %159 = arith.mulf %157, %158 : vector<8x256xf32>
    %160 = arith.addf %149, %159 : vector<8x256xf32>
    %161 = vector.extract_strided_slice %154 {offsets = [0, 1], sizes = [8, 1], strides = [1, 1]} : vector<8x4xf32> to vector<8x1xf32>
    %162 = vector.extract_strided_slice %152 {offsets = [1, 0], sizes = [1, 256], strides = [1, 1]} : vector<4x256xf32> to vector<1x256xf32>
    %163 = vector.broadcast %161 : vector<8x1xf32> to vector<8x256xf32>
    %164 = vector.broadcast %162 : vector<1x256xf32> to vector<8x256xf32>
    %165 = arith.mulf %163, %164 : vector<8x256xf32>
    %166 = arith.addf %160, %165 : vector<8x256xf32>
    %167 = vector.extract_strided_slice %154 {offsets = [0, 2], sizes = [8, 1], strides = [1, 1]} : vector<8x4xf32> to vector<8x1xf32>
    %168 = vector.extract_strided_slice %152 {offsets = [2, 0], sizes = [1, 256], strides = [1, 1]} : vector<4x256xf32> to vector<1x256xf32>
    %169 = vector.broadcast %167 : vector<8x1xf32> to vector<8x256xf32>
    %170 = vector.broadcast %168 : vector<1x256xf32> to vector<8x256xf32>
    %171 = arith.mulf %169, %170 : vector<8x256xf32>
    %172 = arith.addf %166, %171 : vector<8x256xf32>
    %173 = vector.extract_strided_slice %154 {offsets = [0, 3], sizes = [8, 1], strides = [1, 1]} : vector<8x4xf32> to vector<8x1xf32>
    %174 = vector.extract_strided_slice %152 {offsets = [3, 0], sizes = [1, 256], strides = [1, 1]} : vector<4x256xf32> to vector<1x256xf32>
    %175 = vector.broadcast %173 : vector<8x1xf32> to vector<8x256xf32>
    %176 = vector.broadcast %174 : vector<1x256xf32> to vector<8x256xf32>
    %177 = arith.mulf %175, %176 : vector<8x256xf32>
    %178 = arith.addf %172, %177 : vector<8x256xf32>
    %c0_31 = arith.constant 0 : index
    %c143 = arith.constant 143 : index
    %179 = vector.load %arg6[%c0_31, %c143] : memref<4x512xf32, #tpu.memory_space<vmem>>, vector<4x256xf32>
    %180 = vector.broadcast %6 : vector<1x256xf32> to vector<4x256xf32>
    %181 = arith.mulf %179, %180 : vector<4x256xf32>
    %c6 = arith.constant 6 : index
    %c0_32 = arith.constant 0 : index
    %c0_33 = arith.constant 0 : index
    %182 = vector.load %arg2[%c6, %c0_32, %c0_33] : memref<9x8x4xf32, #tpu.memory_space<vmem>>, vector<1x8x4xf32>
    %183 = vector.shape_cast %182 : vector<1x8x4xf32> to vector<8x4xf32>
    %184 = vector.extract_strided_slice %183 {offsets = [0, 0], sizes = [8, 1], strides = [1, 1]} : vector<8x4xf32> to vector<8x1xf32>
    %185 = vector.extract_strided_slice %181 {offsets = [0, 0], sizes = [1, 256], strides = [1, 1]} : vector<4x256xf32> to vector<1x256xf32>
    %186 = vector.broadcast %184 : vector<8x1xf32> to vector<8x256xf32>
    %187 = vector.broadcast %185 : vector<1x256xf32> to vector<8x256xf32>
    %188 = arith.mulf %186, %187 : vector<8x256xf32>
    %189 = arith.addf %178, %188 : vector<8x256xf32>
    %190 = vector.extract_strided_slice %183 {offsets = [0, 1], sizes = [8, 1], strides = [1, 1]} : vector<8x4xf32> to vector<8x1xf32>
    %191 = vector.extract_strided_slice %181 {offsets = [1, 0], sizes = [1, 256], strides = [1, 1]} : vector<4x256xf32> to vector<1x256xf32>
    %192 = vector.broadcast %190 : vector<8x1xf32> to vector<8x256xf32>
    %193 = vector.broadcast %191 : vector<1x256xf32> to vector<8x256xf32>
    %194 = arith.mulf %192, %193 : vector<8x256xf32>
    %195 = arith.addf %189, %194 : vector<8x256xf32>
    %196 = vector.extract_strided_slice %183 {offsets = [0, 2], sizes = [8, 1], strides = [1, 1]} : vector<8x4xf32> to vector<8x1xf32>
    %197 = vector.extract_strided_slice %181 {offsets = [2, 0], sizes = [1, 256], strides = [1, 1]} : vector<4x256xf32> to vector<1x256xf32>
    %198 = vector.broadcast %196 : vector<8x1xf32> to vector<8x256xf32>
    %199 = vector.broadcast %197 : vector<1x256xf32> to vector<8x256xf32>
    %200 = arith.mulf %198, %199 : vector<8x256xf32>
    %201 = arith.addf %195, %200 : vector<8x256xf32>
    %202 = vector.extract_strided_slice %183 {offsets = [0, 3], sizes = [8, 1], strides = [1, 1]} : vector<8x4xf32> to vector<8x1xf32>
    %203 = vector.extract_strided_slice %181 {offsets = [3, 0], sizes = [1, 256], strides = [1, 1]} : vector<4x256xf32> to vector<1x256xf32>
    %204 = vector.broadcast %202 : vector<8x1xf32> to vector<8x256xf32>
    %205 = vector.broadcast %203 : vector<1x256xf32> to vector<8x256xf32>
    %206 = arith.mulf %204, %205 : vector<8x256xf32>
    %207 = arith.addf %201, %206 : vector<8x256xf32>
    %c0_34 = arith.constant 0 : index
    %c144 = arith.constant 144 : index
    %208 = vector.load %arg6[%c0_34, %c144] : memref<4x512xf32, #tpu.memory_space<vmem>>, vector<4x256xf32>
    %c7 = arith.constant 7 : index
    %c0_35 = arith.constant 0 : index
    %c0_36 = arith.constant 0 : index
    %209 = vector.load %arg2[%c7, %c0_35, %c0_36] : memref<9x8x4xf32, #tpu.memory_space<vmem>>, vector<1x8x4xf32>
    %210 = vector.shape_cast %209 : vector<1x8x4xf32> to vector<8x4xf32>
    %211 = vector.extract_strided_slice %210 {offsets = [0, 0], sizes = [8, 1], strides = [1, 1]} : vector<8x4xf32> to vector<8x1xf32>
    %212 = vector.extract_strided_slice %208 {offsets = [0, 0], sizes = [1, 256], strides = [1, 1]} : vector<4x256xf32> to vector<1x256xf32>
    %213 = vector.broadcast %211 : vector<8x1xf32> to vector<8x256xf32>
    %214 = vector.broadcast %212 : vector<1x256xf32> to vector<8x256xf32>
    %215 = arith.mulf %213, %214 : vector<8x256xf32>
    %216 = arith.addf %207, %215 : vector<8x256xf32>
    %217 = vector.extract_strided_slice %210 {offsets = [0, 1], sizes = [8, 1], strides = [1, 1]} : vector<8x4xf32> to vector<8x1xf32>
    %218 = vector.extract_strided_slice %208 {offsets = [1, 0], sizes = [1, 256], strides = [1, 1]} : vector<4x256xf32> to vector<1x256xf32>
    %219 = vector.broadcast %217 : vector<8x1xf32> to vector<8x256xf32>
    %220 = vector.broadcast %218 : vector<1x256xf32> to vector<8x256xf32>
    %221 = arith.mulf %219, %220 : vector<8x256xf32>
    %222 = arith.addf %216, %221 : vector<8x256xf32>
    %223 = vector.extract_strided_slice %210 {offsets = [0, 2], sizes = [8, 1], strides = [1, 1]} : vector<8x4xf32> to vector<8x1xf32>
    %224 = vector.extract_strided_slice %208 {offsets = [2, 0], sizes = [1, 256], strides = [1, 1]} : vector<4x256xf32> to vector<1x256xf32>
    %225 = vector.broadcast %223 : vector<8x1xf32> to vector<8x256xf32>
    %226 = vector.broadcast %224 : vector<1x256xf32> to vector<8x256xf32>
    %227 = arith.mulf %225, %226 : vector<8x256xf32>
    %228 = arith.addf %222, %227 : vector<8x256xf32>
    %229 = vector.extract_strided_slice %210 {offsets = [0, 3], sizes = [8, 1], strides = [1, 1]} : vector<8x4xf32> to vector<8x1xf32>
    %230 = vector.extract_strided_slice %208 {offsets = [3, 0], sizes = [1, 256], strides = [1, 1]} : vector<4x256xf32> to vector<1x256xf32>
    %231 = vector.broadcast %229 : vector<8x1xf32> to vector<8x256xf32>
    %232 = vector.broadcast %230 : vector<1x256xf32> to vector<8x256xf32>
    %233 = arith.mulf %231, %232 : vector<8x256xf32>
    %234 = arith.addf %228, %233 : vector<8x256xf32>
    %c0_37 = arith.constant 0 : index
    %c145 = arith.constant 145 : index
    %235 = vector.load %arg6[%c0_37, %c145] : memref<4x512xf32, #tpu.memory_space<vmem>>, vector<4x256xf32>
    %236 = vector.broadcast %7 : vector<1x256xf32> to vector<4x256xf32>
    %237 = arith.mulf %235, %236 : vector<4x256xf32>
    %c8 = arith.constant 8 : index
    %c0_38 = arith.constant 0 : index
    %c0_39 = arith.constant 0 : index
    %238 = vector.load %arg2[%c8, %c0_38, %c0_39] : memref<9x8x4xf32, #tpu.memory_space<vmem>>, vector<1x8x4xf32>
    %239 = vector.shape_cast %238 : vector<1x8x4xf32> to vector<8x4xf32>
    %240 = vector.extract_strided_slice %239 {offsets = [0, 0], sizes = [8, 1], strides = [1, 1]} : vector<8x4xf32> to vector<8x1xf32>
    %241 = vector.extract_strided_slice %237 {offsets = [0, 0], sizes = [1, 256], strides = [1, 1]} : vector<4x256xf32> to vector<1x256xf32>
    %242 = vector.broadcast %240 : vector<8x1xf32> to vector<8x256xf32>
    %243 = vector.broadcast %241 : vector<1x256xf32> to vector<8x256xf32>
    %244 = arith.mulf %242, %243 : vector<8x256xf32>
    %245 = arith.addf %234, %244 : vector<8x256xf32>
    %246 = vector.extract_strided_slice %239 {offsets = [0, 1], sizes = [8, 1], strides = [1, 1]} : vector<8x4xf32> to vector<8x1xf32>
    %247 = vector.extract_strided_slice %237 {offsets = [1, 0], sizes = [1, 256], strides = [1, 1]} : vector<4x256xf32> to vector<1x256xf32>
    %248 = vector.broadcast %246 : vector<8x1xf32> to vector<8x256xf32>
    %249 = vector.broadcast %247 : vector<1x256xf32> to vector<8x256xf32>
    %250 = arith.mulf %248, %249 : vector<8x256xf32>
    %251 = arith.addf %245, %250 : vector<8x256xf32>
    %252 = vector.extract_strided_slice %239 {offsets = [0, 2], sizes = [8, 1], strides = [1, 1]} : vector<8x4xf32> to vector<8x1xf32>
    %253 = vector.extract_strided_slice %237 {offsets = [2, 0], sizes = [1, 256], strides = [1, 1]} : vector<4x256xf32> to vector<1x256xf32>
    %254 = vector.broadcast %252 : vector<8x1xf32> to vector<8x256xf32>
    %255 = vector.broadcast %253 : vector<1x256xf32> to vector<8x256xf32>
    %256 = arith.mulf %254, %255 : vector<8x256xf32>
    %257 = arith.addf %251, %256 : vector<8x256xf32>
    %258 = vector.extract_strided_slice %239 {offsets = [0, 3], sizes = [8, 1], strides = [1, 1]} : vector<8x4xf32> to vector<8x1xf32>
    %259 = vector.extract_strided_slice %237 {offsets = [3, 0], sizes = [1, 256], strides = [1, 1]} : vector<4x256xf32> to vector<1x256xf32>
    %260 = vector.broadcast %258 : vector<8x1xf32> to vector<8x256xf32>
    %261 = vector.broadcast %259 : vector<1x256xf32> to vector<8x256xf32>
    %262 = arith.mulf %260, %261 : vector<8x256xf32>
    %263 = arith.addf %257, %262 : vector<8x256xf32>
    %c0_40 = arith.constant 0 : index
    %c0_41 = arith.constant 0 : index
    %264 = vector.load %arg3[%c0_40, %c0_41] : memref<8x1xf32, #tpu.memory_space<vmem>>, vector<8x1xf32>
    %265 = vector.broadcast %264 : vector<8x1xf32> to vector<8x256xf32>
    %266 = arith.addf %263, %265 : vector<8x256xf32>
    %cst_42 = arith.constant 0.000000e+00 : f32
    %267 = vector.broadcast %cst_42 : f32 to vector<8x256xf32>
    %268 = arith.maximumf %266, %267 : vector<8x256xf32>
    %269 = vector.shape_cast %268 : vector<8x256xf32> to vector<1x8x256xf32>
    %c0_43 = arith.constant 0 : index
    %c0_44 = arith.constant 0 : index
    %c0_45 = arith.constant 0 : index
    %270 = vector.load %arg5[%c0_43, %c0_44, %c0_45] : memref<1x8x256xf32, #tpu.memory_space<vmem>>, vector<1x8x256xf32>
    tpu.vector_store %arg5[%c0_43, %c0_44, %c0_45], %269 {strides = array<i32>} : memref<1x8x256xf32, #tpu.memory_space<vmem>>, vector<1x8x256xf32>,
    return
  }
  func.func @transform_0(%arg0: i32) -> (i32, i32, i32) {
    %c0_i32 = arith.constant 0 : i32
    %c0_i32_0 = arith.constant 0 : i32
    %c0_i32_1 = arith.constant 0 : i32
    return %arg0, %c0_i32, %c0_i32_0 : i32, i32, i32
  }
  func.func @transform_1(%arg0: i32) -> (i32, i32, i32) {
    %c0_i32 = arith.constant 0 : i32
    %c0_i32_0 = arith.constant 0 : i32
    %c0_i32_1 = arith.constant 0 : i32
    %c0_i32_2 = arith.constant 0 : i32
    return %c0_i32, %c0_i32_0, %c0_i32_1 : i32, i32, i32
  }
  func.func @transform_2(%arg0: i32) -> (i32, i32) {
    %c0_i32 = arith.constant 0 : i32
    %c0_i32_0 = arith.constant 0 : i32
    %c0_i32_1 = arith.constant 0 : i32
    return %c0_i32, %c0_i32_0 : i32, i32
  }
  func.func @transform_3(%arg0: i32) -> (i32, i32) {
    %c0_i32 = arith.constant 0 : i32
    %c0_i32_0 = arith.constant 0 : i32
    %c0_i32_1 = arith.constant 0 : i32
    return %c0_i32, %c0_i32_0 : i32, i32
  }
  func.func @transform_4(%arg0: i32) -> (i32, i32, i32) {
    %c0_i32 = arith.constant 0 : i32
    %c0_i32_0 = arith.constant 0 : i32
    %c0_i32_1 = arith.constant 0 : i32
    return %arg0, %c0_i32, %c0_i32_0 : i32, i32, i32
  }
}

</mosaic_0001>

<bundles_post_ra>
// kernel: tpu_custom_call.1
= control target key start
LH: loop header
LB: loop body
LE: loop exit
PB: predicated region body
PF: predicated region fallthrough
CT: control target
= control target key end

     0   :  { %9 = vsyncpa [#allocation4], 0  ;;  %s3292_s0 = inlined_call_operand.vmem [shape: f32[2,4,256], index: 0, kind: input, shape index: {}]   ;;  %s3293_s1 = inlined_call_operand.vmem [shape: f32[9,8,4], index: 1, kind: input, shape index: {}]   ;;  %s3294_s2 = inlined_call_operand.vmem [shape: f32[8,1], index: 2, kind: input, shape index: {}]   ;;  %s3295_s3 = inlined_call_operand.vmem [shape: f32[2,256], index: 3, kind: input, shape index: {}]   ;;  %s3296_s4 = inlined_call_operand.hbm [shape: f32[2,8,256], index: 4, kind: output, shape index: {}]  }
   0x1   :  { %11 = vsyncpa [#allocation4 + $0x1], 0  ;;  %s2379_s15 = smov 0   ;;  %s2381_s16 = smov 0  }
   0x2   :  { %s2383_s17 = smov 0   ;;  %s2385_s18 = smov 0  }
   0x3 LB: > { %s2400_s19 = sadd.s32 4294967295, %s2334_s18   ;;  %s2164_s20 = sadd.s32 4294967294, %s2334_s18   ;;  %s2334_s18 = sphi %s2385_s18, %s3302_s18   ;;  %s2330_s17 = sphi %s2383_s17, %s3301_s17   ;;  %s2326_s16 = sphi %s2381_s16, %s3300_s16   ;;  %s2322_s15 = sphi %s2379_s15, %s3299_s15  }
   0x4   : > { %s2404_s21 = sadd.s32 1, %s2334_s18   ;;  %s113_s22 = sadd.s32 1, %s2330_s17 }
   0x5   : > { %s110_s23 = ssub.s32 %s2334_s18, %s2404_s21  ;;  %p123_p0 = scmp.ne.s32.totalorder %s2330_s17, %s2326_s16 }
   0x6   : > { %p111_p1 = scmp.eq.s32.totalorder %s110_s23, 0  ;;  %p124_p2 = scmp.eq.s32.totalorder %s2400_s19, 1 }
   0x7   : > { %p129_p3 = scmp.ne.s32.totalorder %s2326_s16, %s2322_s15  ;;  %p130_p4 = scmp.eq.s32.totalorder %s2164_s20, 1 }
   0x8   : > { %s2415_s24 = scalar_select %p111_p1, %s2330_s17, %s113_s22  }
   0x9   : > { %p2417_p5 = por %p124_p2, %p123_p0  ;;  %p2421_p6 = por %p130_p4, %p129_p3 }
   0xa   : > { %p2167_p7 = scmp.ge.s32.totalorder %s2334_s18, 1  ;;  %p165_p8 = scmp.lt.s32.totalorder %s2334_s18, 3 }
   0xc   : > { %p166_p9 = pnand %p2167_p7, %p165_p8 }
   0xd   : > { %v2172_v0 = vld [vmem:[%s3293_s1 + $0x8] sm:$0xff] (!%p166_p9)  ;;  %v224_v1 = vld [vmem:[%s3293_s1] sm:$0xff] (!%p166_p9)  ;;  %v206_v2 = vlaneseq (!%p166_p9)  ;;  %v2336_v3 = vmov (!%p166_p9), 1   ;;  %p191_p10 = scmp.lt.s32.totalorder (!%p166_p9), %s2400_s19, 1  ;;  %v2337_v8 = vmov (!%p166_p9), 0.0   ;;  %v2338_v9 = vmov (!%p166_p9), 2  }
   0xe   : > { %169 = sbr.rel (%p166_p9) target bundleno = 738 (0x2e2), region = 36  ;;  %2246 = vset.pattern.permute.xlu0 (!%p166_p9), %v2336_v3  ;;  %2243 = vset.pattern.permute.xlu1 (!%p166_p9), %v2336_v3  ;;  %v200_v5 = vld [vmem:[%s3295_s3] ss:$2 sm:$0x3] (!%p166_p9)  ;;  %196 = vst [vmem:[#allocation2] sm:$0xf] (!%p166_p9), %v2337_v8 }
   0xf   : > { %436 = vperm.xlu0 (!%p166_p9), %2246, %v2172_v0   ;;  %266 = vperm.xlu1 (!%p166_p9), %2243, %v224_v1   ;;  %v2435_v4 = vshrl.u32 (!%p166_p9), %v206_v2, 7  ;;  %197 = vst [vmem:[#allocation2 + $0xc] sm:$0xf] (!%p166_p9), %v2337_v8  ;;  %s2339_s12 = smov (!%p166_p9), 111   ;;  %v2340_v14 = vmov (!%p166_p9), 3   ;;  %v2174_v15 = vld [vmem:[%s3293_s1 + $0x18] sm:$0xff] (!%p166_p9) }
  0x10   : > { %v2176_v16 = vld [vmem:[%s3293_s1 + $0x28] sm:$0xff] (!%p166_p9)  ;;  %v2171_v17 = vld [vmem:[%s3295_s3 + $0x1] ss:$2 sm:$0x3] (!%p166_p9)  ;;  %s2341_s28 = smov (!%p166_p9), 15   ;;  %v2477_v21 = vld [vmem:[%s3293_s1 + $0x30] sm:$0xff] (!%p166_p9) }
  0x11   : > { %v2441_v6 = vsub.s32 (!%p166_p9), 0, %v2435_v4  ;;  %v2444_v7 = vsub.s32 (!%p166_p9), 1, %v2435_v4  ;;  %s2342_s5 = smov (!%p166_p9), 113   ;;  %v2173_v22 = vld [vmem:[%s3293_s1 + $0x10] sm:$0xff] (!%p166_p9)  ;;  %v2488_v23 = vld [vmem:[%s3293_s1 + $0x38] sm:$0xff] (!%p166_p9)  ;;  %v2343_v24 = vmov (!%p166_p9), 0  }
  0x12   : > { %s2344_s10 = smov (!%p166_p9), 127   ;;  %v2500_v25 = vld [vmem:[%s3293_s1 + $0x20] sm:$0xff] (!%p166_p9)  ;;  %s2345_s14 = smov (!%p166_p9), 1   ;;  %v2548_v40 = vsub.s32 (!%p166_p9), 4, %v2435_v4  ;;  %v2559_v46 = vsub.s32 (!%p166_p9), 2, %v2435_v4  ;;  %v2570_v53 = vsub.s32 (!%p166_p9), 5, %v2435_v4 }
  0x13   : > { %2244 = vset.pattern.permute.xlu1 (!%p166_p9), %v2338_v9  ;;  %v209_v10 = vrot.slane (!%p166_p9), %v200_v5, %v2441_v6  ;;  %v213_v11 = vrot.slane (!%p166_p9), %v200_v5, %v2444_v7  ;;  %v592_v18 = vrot.slane (!%p166_p9), %v2171_v17, %v2441_v6  ;;  %v596_v19 = vrot.slane (!%p166_p9), %v2171_v17, %v2444_v7  ;;  %s2346_s20 = smov (!%p166_p9), 126   ;;  %s2347_s22 = smov (!%p166_p9), 112  }
  0x14   : > { %303 = vperm.xlu1 (!%p166_p9), %2244, %v224_v1   ;;  %v2587_v5 = vsub.s32 (!%p166_p9), 6, %v2435_v4  ;;  %v2590_v8 = vsub.s32 (!%p166_p9), 3, %v2435_v4  ;;  %vm601_vm0 = vcmask (!%p166_p9), 924672   ;;  %vm426_vm1 = vcmask (!%p166_p9), 1039360   ;;  %s2349_s29 = smov (!%p166_p9), 110   ;;  %s2351_s30 = smov (!%p166_p9), 95  }
  0x15   : > { %s192_s7 = scalar_select %p191_p10, %s2400_s19, 1  ;;  %v214_v12 = vcombine.low %v209_v10, %v213_v11  ;;  %v2472_v20 = vcombine.low %v592_v18, %v596_v19  ;;  %vm218_vm2 = vcmask 908288   ;;  %vm655_vm3 = vcmask 1031168  }
  0x16   : > { %vm1195_vm4 = vcmask 7168   ;;  %vm875_vm5 = vcmask 916480   ;;  %vm1416_vm6 = vcmask 121856   ;;  %vm1847_vm7 = vcmask 138240  }
  0x17   : > { %s2185_s8 = sshll.u32 %s192_s7, 3  ;;  %215 = vrot.lane.b32.xlu0 %v214_v12, %s2339_s12  ;;  %vm1249_vm8 = vcmask 900096   ;;  %vm1470_vm9 = vcmask 785408   ;;  %vm1682_vm10 = vcmask 777216   ;;  %vm1901_vm11 = vcmask 769024  }
  0x18   : > { %s195_s11 = scalar_lea.vmem %s3292_s0, %s2185_s8  ;;  %2245 = vset.pattern.permute.xlu1 %v2340_v14  ;;  %s188_s8 = sand.u32 1, %s2326_s16  }
  0x19   : > { %v2455_v13 = vld [vmem:[%s195_s11] sm:$0xff]  ;;  %340 = vperm.xlu1 %2245, %v224_v1   ;;  %s2168_s9 = sshll.u32 %s188_s8, 4  ;;  %s2091_s23 = scalar_lea.sflag [#allocation4], %s188_s8 }
  0x1a   : > { %199 = vst [vmem:[#allocation2 + $0x4] sm:$0xff] %v2455_v13  ;;  %s190_s11 = scalar_lea.vmem [#allocation3], %s2168_s9 }
  0x1b   : > { %885 = vperm.xlu0 %2246, %v2174_v15   ;;  %s2105_s13 = sshll.u32 %s190_s11, 4  ;;  %s3251_s13 = int_to_ptr.vmem [resolvable:$true] %s2105_s13 }
  0x1c   : > { %s2272_s27 = scalar_lea.vmem %s3251_s13, 256 }
  0x1d   : > { %2247 = vset.pattern.permute.xlu1 %v2338_v9  ;;  %p2273_p11 = scmp.ne.s32.totalorder %s3251_s13, %s2272_s27 }
  0x1e   : > { %487 = vperm.xlu1 %2247, %v2172_v0  }
  0x1f   : > { %1259 = vperm.xlu0 %2246, %v2176_v16   ;;  %p2274_p12 = pnand %p2273_p11, %p2417_p5 }
  0x21   : > { %v2550_v41 = vld [vmem:[#allocation2] sm:$0xff]  ;;  %v377_v44 = vld [vmem:[#allocation2 + $0x8] sm:$0xf]  ;;  %p2275_p13 = pneg %p2274_p12 }
  0x22   : > { %2248 = vset.pattern.permute.xlu1 %v2340_v14  ;;  %v394_v42 = vrot.slane %v2550_v41, %v2548_v40  ;;  %v390_v43 = vrot.slane %v2550_v41, %v2441_v6  ;;  %v450_v50 = vrot.slane %v377_v44, %v2444_v7  ;;  %v398_v51 = vrot.slane %v377_v44, %v2441_v6 }
  0x23   : > { %538 = vperm.xlu1 %2248, %v2172_v0   ;;  %1413 = vrot.lane.b32.xlu0 %v214_v12, %s2341_s28  ;;  %v493_v52 = vrot.slane %v2550_v41, %v2559_v46  ;;  %v442_v56 = vrot.slane %v2550_v41, %v2444_v7  ;;  %v446_v62 = vrot.slane %v2550_v41, %v2570_v53  ;;  %s2348_s28 = smov 17  }
  0x24   : > { %v409_v48 = vrot.slane %v394_v42, %v2441_v6  ;;  %v405_v49 = vrot.slane %v390_v43, %v2441_v6  ;;  %v465_v59 = vrot.slane %v450_v50, %v2444_v7  ;;  %v413_v60 = vrot.slane %v398_v51, %v2441_v6  ;;  %v818_v43 = vld [vmem:[#allocation2 + $0x8] sm:$0xf] }
  0x25   : > { %v508_v61 = vrot.slane %v493_v52, %v2559_v46  ;;  %v501_v2 = vrot.slane %v377_v44, %v2559_v46  ;;  %v2606_v42 = vsub.s32 7, %v2435_v4  ;;  %v552_v50 = vrot.slane %v377_v44, %v2590_v8 }
  0x27   : > { %598 = vrot.lane.b32.xlu1 %v2472_v20, %s2342_s5  ;;  %1480 = vperm.xlu0 %2246, %v2477_v21   ;;  %v548_v51 = vrot.slane %v2550_v41, %v2606_v42  ;;  %s2352_s5 = smov 94  }
  0x28   : > { %2249 = vset.pattern.permute.xlu1 %v2336_v3 }
  0x2b   : > { %665 = vperm.xlu1 %2249, %v2173_v22   ;;  %2263 = vset.pattern.permute.xlu0 %v2338_v9 }
  0x2c   : > { %1743 = vperm.xlu0 %2263, %v2488_v23  }
  0x2f   : > { %2250 = vset.pattern.permute.xlu1 %v2338_v9 }
  0x30   : > { %716 = vperm.xlu1 %2250, %v2173_v22   ;;  %2264 = vset.pattern.permute.xlu0 %v2343_v24 }
  0x31   : > { %227 = vperm.xlu0 %2264, %v224_v1   ;;  %v457_v1 = vrot.slane %v442_v56, %v2444_v7 }
  0x34   : > { %2251 = vset.pattern.permute.xlu1 %v2340_v14 }
  0x35   : > { %767 = vperm.xlu1 %2251, %v2173_v22   ;;  %382 = vperm.xlu0 %2264, %v2172_v0  }
  0x39   : > { %819 = vrot.lane.b32.xlu1 %v214_v12, %s2344_s10  ;;  %611 = vperm.xlu0 %2264, %v2173_v22   ;;  %v461_v12 = vrot.slane %v446_v62, %v2444_v7  ;;  %v516_v22 = vrot.slane %v501_v2, %v2559_v46 }
  0x3a   : > { %2252 = vset.pattern.permute.xlu1 %v2338_v9 }
  0x3d   : > { %936 = vperm.xlu1 %2252, %v2174_v15   ;;  %831 = vperm.xlu0 %2264, %v2174_v15  }
  0x41   : > { %2253 = vset.pattern.permute.xlu1 %v2340_v14  ;;  %1042 = vperm.xlu0 %2264, %v2500_v25  }
  0x42   : > { %987 = vperm.xlu1 %2253, %v2174_v15   ;;  %v544_v15 = vrot.slane %v2550_v41, %v2590_v8 }
  0x46   : > { %2254 = vset.pattern.permute.xlu1 %v2336_v3 }
  0x47   : > { %1080 = vperm.xlu1 %2254, %v2500_v25  }
  0x4b   : > { %2255 = vset.pattern.permute.xlu1 %v2338_v9 }
  0x4c   : > { %1117 = vperm.xlu1 %2255, %v2500_v25  }
  0x50   : > { %1192 = vrot.lane.b32.xlu1 %v2472_v20, %s2345_s14 }
  0x51   : > { %2256 = vset.pattern.permute.xlu1 %v2343_v24 }
  0x54   : > { %1205 = vperm.xlu1 %2256, %v2176_v16  }
  0x58   : > { %2257 = vset.pattern.permute.xlu1 %v2338_v9 }
  0x59   : > { %1310 = vperm.xlu1 %2257, %v2176_v16  }
  0x5d   : > { %2258 = vset.pattern.permute.xlu1 %v2340_v14 }
  0x5e   : > { %1361 = vperm.xlu1 %2258, %v2176_v16   ;;  %v497_v16 = vrot.slane %v2550_v41, %v2587_v5 }
  0x62   : > { %2259 = vset.pattern.permute.xlu1 %v2343_v24 }
  0x63   : > { %1426 = vperm.xlu1 %2259, %v2477_v21  }
  0x67   : > { %2260 = vset.pattern.permute.xlu1 %v2338_v9 }
  0x68   : > { %1531 = vperm.xlu1 %2260, %v2477_v21  }
  0x6c   : > { %2261 = vset.pattern.permute.xlu1 %v2343_v24 }
  0x6d   : > { %1638 = vperm.xlu1 %2261, %v2488_v23  }
  0x71   : > { %2262 = vset.pattern.permute.xlu1 %v2336_v3 }
  0x72   : > { %1692 = vperm.xlu1 %2262, %v2488_v23  }
  0x76   : > { %2265 = vset.pattern.permute.xlu1 %v2340_v14 }
  0x8e   : > { %v2521_v26 = vpop.permute.xlu1 %266  ;;  %v2523_v27 = vpop.permute.xlu0 %436 }
  0x8f   : > { %v468_v63 = vmul.f32 %v465_v59, %v2523_v27  ;;  %v466_v19 = vmul.f32 %v457_v1, %v2523_v27  ;;  %v467_v56 = vmul.f32 %v461_v12, %v2523_v27  ;;  %v567_v59 = vrot.slane %v552_v50, %v2590_v8 }
  0x92   : > { %v2527_v29 = vpop.permute.xlu0 %215 }
  0x93   : > { %v2525_v28 = vpop.permute.xlu1 %303 }
  0x98   : > { %v2529_v30 = vpop.permute.xlu1 %340 }
  0x9a   : > { %v2531_v31 = vpop.permute.xlu0 %885 }
  0x9d   : > { %v2533_v32 = vpop.permute.xlu1 %487 }
  0x9e   : > { %v2535_v33 = vpop.permute.xlu0 %1259  ;;  %v517_v11 = vmul.f32 %v508_v61, %v2533_v32 }
  0xa2   : > { %v2537_v34 = vpop.permute.xlu0 %1413  ;;  %v2539_v35 = vpop.permute.xlu1 %538 }
  0xa6   : > { %v2541_v36 = vpop.permute.xlu0 %1480  ;;  %v599_v37 = vpop.permute.xlu1 %598 }
  0xa7   : > { %v600_v17 = vrot.slane %v599_v37, 4 }
  0xa9   : > { %v606_v52 = vmul.f32 %v600_v17, %v377_v44 }
  0xaa   : > { %v2543_v38 = vpop.permute.xlu1 %665 }
  0xab   : > { %v2545_v39 = vpop.permute.xlu0 %1743  ;;  %v627_v62 = vrot.slane %v606_v52, %v2441_v6 }
  0xad   : > { %v642_v1 = vrot.slane %v627_v62, %v2441_v6 }
  0xaf   : > { %v2556_v45 = vpop.permute.xlu1 %716 }
  0xb0   : > { %v2561_v47 = vpop.permute.xlu0 %227 }
  0xb4   : > { %v2572_v54 = vpop.permute.xlu1 %767  ;;  %v383_v55 = vpop.permute.xlu0 %382 }
  0xb5   : > { %v415_v57 = vmul.f32 %v409_v48, %v383_v55  ;;  %v414_v58 = vmul.f32 %v405_v49, %v383_v55  ;;  %v416_v0 = vmul.f32 %v413_v60, %v383_v55  ;;  %v559_v48 = vrot.slane %v544_v15, %v2590_v8 }
  0xb6   : > { %v512_v49 = vrot.slane %v497_v16, %v2559_v46  ;;  %v519_v55 = vmul.f32 %v516_v22, %v2533_v32  ;;  %v563_v60 = vrot.slane %v548_v51, %v2590_v8  ;;  %v730_v16 = vrot.slane %v606_v52, %v2559_v46 }
  0xb7   : > { %422 = vrot.lane.b32.xlu0 %v415_v57, %s2344_s10  ;;  %420 = vrot.lane.b32.xlu1 %v414_v58, %s2344_s10  ;;  %v602_v57 = vsel %vm601_vm0, %v600_v17, %v599_v37  ;;  %v568_v61 = vmul.f32 %v559_v48, %v2539_v35  ;;  %v781_v48 = vrot.slane %v606_v52, %v2590_v8 }
  0xb8   : > { %v2592_v10 = vpop.permute.xlu1 %819  ;;  %v518_v58 = vmul.f32 %v512_v49, %v2533_v32  ;;  %v2627_v44 = vmul.f32 %v602_v57, %v2550_v41  ;;  %v612_v37 = vpop.permute.xlu0 %611  ;;  %v570_v32 = vmul.f32 %v567_v59, %v2539_v35 }
  0xb9   : > { %v821_v18 = vrot.slane %v2592_v10, 4  ;;  %v645_v17 = vmul.f32 %v642_v1, %v612_v37  ;;  %v796_v59 = vrot.slane %v781_v48, %v2590_v8 }
  0xba   : > { %v623_v22 = vrot.slane %v2627_v44, %v2548_v40  ;;  %v726_v57 = vrot.slane %v2627_v44, %v2587_v5 }
  0xbb   : > { %476 = vrot.lane.b32.xlu0 %v468_v63, %s2344_s10  ;;  %424 = vrot.lane.b32.xlu1 %v416_v0, %s2344_s10  ;;  %v2617_v4 = vmul.f32 %v821_v18, %v818_v43  ;;  %v679_v63 = vrot.slane %v606_v52, %v2444_v7  ;;  %v569_v0 = vmul.f32 %v563_v60, %v2539_v35 }
  0xbc   : > { %v2644_v12 = vpop.permute.xlu0 %831  ;;  %v745_v43 = vrot.slane %v730_v16, %v2559_v46  ;;  %v638_v51 = vrot.slane %v623_v22, %v2441_v6 }
  0xbd   : > { %v847_v27 = vrot.slane %v2617_v4, %v2441_v6  ;;  %v694_v15 = vrot.slane %v679_v63, %v2444_v7  ;;  %v799_v63 = vmul.f32 %v796_v59, %v2572_v54 }
  0xbe   : > { %v748_v52 = vmul.f32 %v745_v43, %v2556_v45 }
  0xbf   : > { %523 = vrot.lane.b32.xlu0 %v517_v11, %s2344_s10  ;;  %472 = vrot.lane.b32.xlu1 %v466_v19, %s2344_s10  ;;  %v862_v2 = vrot.slane %v847_v27, %v2441_v6  ;;  %v619_v11 = vrot.slane %v2627_v44, %v2441_v6  ;;  %v697_v49 = vmul.f32 %v694_v15, %v2543_v38 }
  0xc0   : > { %v741_v27 = vrot.slane %v726_v57, %v2559_v46  ;;  %v773_v15 = vrot.slane %v2627_v44, %v2590_v8 }
  0xc1   : > { %v865_v35 = vmul.f32 %v862_v2, %v2644_v12  ;;  %v634_v19 = vrot.slane %v619_v11, %v2441_v6 }
  0xc2   : > { %v747_v2 = vmul.f32 %v741_v27, %v2556_v45 }
  0xc3   : > { %527 = vrot.lane.b32.xlu0 %v519_v55, %s2344_s10  ;;  %474 = vrot.lane.b32.xlu1 %v467_v56, %s2344_s10  ;;  %v643_v50 = vmul.f32 %v634_v19, %v612_v37  ;;  %v675_v55 = vrot.slane %v2627_v44, %v2570_v53  ;;  %v671_v56 = vrot.slane %v2627_v44, %v2444_v7 }
  0xc5   : > { %v690_v60 = vrot.slane %v675_v55, %v2444_v7  ;;  %v686_v62 = vrot.slane %v671_v56, %v2444_v7 }
  0xc7   : > { %574 = vrot.lane.b32.xlu0 %v568_v61, %s2344_s10  ;;  %525 = vrot.lane.b32.xlu1 %v518_v58, %s2344_s10  ;;  %v644_v58 = vmul.f32 %v638_v51, %v612_v37  ;;  %v822_v61 = vsel %vm426_vm1, %v821_v18, %v2592_v10  ;;  %v722_v37 = vrot.slane %v2627_v44, %v2559_v46 }
  0xc8   : > { %v777_v10 = vrot.slane %v2627_v44, %v2606_v42  ;;  %v695_v18 = vmul.f32 %v686_v62, %v2543_v38  ;;  %v937_v44 = vpop.permute.xlu1 %936  ;;  %v950_v62 = vrot.slane %v2617_v4, %v2559_v46 }
  0xc9   : > { %v737_v1 = vrot.slane %v722_v37, %v2559_v46 }
  0xca   : > { %v792_v11 = vrot.slane %v777_v10, %v2590_v8  ;;  %v965_v10 = vrot.slane %v950_v62, %v2559_v46 }
  0xcb   : > { %578 = vrot.lane.b32.xlu0 %v570_v32, %s2344_s10  ;;  %576 = vrot.lane.b32.xlu1 %v569_v0, %s2344_s10  ;;  %v2680_v32 = vmul.f32 %v822_v61, %v2550_v41  ;;  %v696_v0 = vmul.f32 %v690_v60, %v2543_v38  ;;  %s2186_s10 = sshll.u32 %s2400_s19, 8  ;;  %s2353_s19 = smov [#allocation3]  }
  0xcc   : > { %v798_v38 = vmul.f32 %v792_v11, %v2572_v54  ;;  %v1049_v11 = vrot.slane %v2455_v13, %v2441_v6 }
  0xcd   : > { %v839_v16 = vrot.slane %v2680_v32, %v2441_v6  ;;  %v843_v48 = vrot.slane %v2680_v32, %v2548_v40  ;;  %v891_v55 = vrot.slane %v2680_v32, %v2444_v7  ;;  %v993_v59 = vrot.slane %v2680_v32, %v2590_v8 }
  0xcf   : > { %653 = vrot.lane.b32.xlu0 %v645_v17, %s2346_s20  ;;  %873 = vrot.lane.b32.xlu1 %v865_v35, %s2347_s22  ;;  %v746_v17 = vmul.f32 %v737_v1, %v2556_v45  ;;  %v788_v35 = vrot.slane %v773_v15, %v2590_v8  ;;  %v854_v19 = vrot.slane %v839_v16, %v2441_v6  ;;  %v2179_v45 = vld [vmem:[%s3293_s1 + $0x40] sm:$0xff] }
  0xd0   : > { %v1090_v16 = vrot.slane %v2455_v13, %v2570_v53 }
  0xd1   : > { %v797_v22 = vmul.f32 %v788_v35, %v2572_v54  ;;  %v863_v43 = vmul.f32 %v854_v19, %v2644_v12  ;;  %v1043_v19 = vpop.permute.xlu0 %1042 }
  0xd3   : > { %705 = vrot.lane.b32.xlu0 %v697_v49, %s2346_s20  ;;  %649 = vrot.lane.b32.xlu1 %v643_v50, %s2346_s20  ;;  %v858_v49 = vrot.slane %v843_v48, %v2441_v6  ;;  %v988_v50 = vpop.permute.xlu1 %987 }
  0xd5   : > { %v864_v54 = vmul.f32 %v858_v49, %v2644_v12  ;;  %v906_v12 = vrot.slane %v891_v55, %v2444_v7 }
  0xd7   : > { %756 = vrot.lane.b32.xlu0 %v748_v52, %s2346_s20  ;;  %651 = vrot.lane.b32.xlu1 %v644_v58, %s2346_s20  ;;  %v2721_v51 = vpop.permute.xlu1 %1080  ;;  %v942_v52 = vrot.slane %v2680_v32, %v2559_v46 }
  0xd9   : > { %v957_v61 = vrot.slane %v942_v52, %v2559_v46 }
  0xdb   : > { %807 = vrot.lane.b32.xlu0 %v799_v63, %s2346_s20  ;;  %703 = vrot.lane.b32.xlu1 %v696_v0, %s2346_s20  ;;  %v2731_v56 = vpop.permute.xlu1 %1117  ;;  %v1008_v63 = vrot.slane %v993_v59, %v2590_v8  ;;  %v1001_v0 = vrot.slane %v2617_v4, %v2590_v8 }
  0xdd   : > { %v1017_v1 = vmul.f32 %v1008_v63, %v988_v50 }
  0xdf   : > { %701 = vrot.lane.b32.xlu0 %v695_v18, %s2346_s20  ;;  %754 = vrot.lane.b32.xlu1 %v747_v2, %s2346_s20  ;;  %v2743_v58 = vpop.permute.xlu1 %1192  ;;  %v997_v18 = vrot.slane %v2680_v32, %v2606_v42  ;;  %v1016_v2 = vrot.slane %v1001_v0, %v2590_v8 }
  0xe1   : > { %v1012_v15 = vrot.slane %v997_v18, %v2590_v8  ;;  %v1019_v35 = vmul.f32 %v1016_v2, %v988_v50 }
  0xe3   : > { %752 = vrot.lane.b32.xlu0 %v746_v17, %s2346_s20  ;;  %805 = vrot.lane.b32.xlu1 %v798_v38, %s2346_s20  ;;  %v2757_v27 = vpop.permute.xlu1 %1205  ;;  %v1086_v17 = vrot.slane %v2455_v13, %v2444_v7 }
  0xe5   : > { %v2792_v48 = vrot.slane %v1086_v17, %v2444_v7 }
  0xe7   : > { %803 = vrot.lane.b32.xlu0 %v797_v22, %s2346_s20  ;;  %869 = vrot.lane.b32.xlu1 %v863_v43, %s2347_s22  ;;  %v1018_v22 = vmul.f32 %v1012_v15, %v988_v50  ;;  %v2788_v43 = vrot.slane %v1090_v16, %v2444_v7  ;;  %v1749_v50 = vrot.slane %v2455_v13, %v2559_v46 }
  0xeb   : > { %1857 = vperm.xlu0 %2264, %v2179_v45   ;;  %1794 = vperm.xlu1 %2265, %v2488_v23   ;;  %v899_v23 = vrot.slane %v2617_v4, %v2444_v7  ;;  %v968_v4 = vmul.f32 %v965_v10, %v937_v44 }
  0xef   : > { %871 = vrot.lane.b32.xlu0 %v864_v54, %s2347_s22  ;;  %1844 = vrot.lane.b32.xlu1 %v2472_v20, %s2348_s28  ;;  %v895_v20 = vrot.slane %v2680_v32, %v2570_v53 }
  0xf0   : > { %2266 = vset.pattern.permute.xlu0 %v2340_v14  ;;  %2267 = vset.pattern.permute.xlu1 %v2336_v3  ;;  %v914_v3 = vrot.slane %v899_v23, %v2444_v7  ;;  %v946_v14 = vrot.slane %v2680_v32, %v2587_v5  ;;  %v2775_v32 = vpop.permute.xlu1 %1310  ;;  %v1102_v23 = vmul.f32 %v2788_v43, %v2721_v51 }
  0xf1   : > { %v910_v57 = vrot.slane %v895_v20, %v2444_v7 }
  0xf3   : > { %1154 = vperm.xlu0 %2266, %v2500_v25   ;;  %1911 = vperm.xlu1 %2267, %v2179_v45   ;;  %v915_v25 = vmul.f32 %v906_v12, %v2531_v31  ;;  %v916_v60 = vmul.f32 %v910_v57, %v2531_v31  ;;  %v1101_v12 = vmul.f32 %v2792_v48, %v2721_v51  ;;  %v217_v51 = vrot.slane %v2527_v29, 4 }
  0xf4   : > { %v2798_v54 = vpop.permute.xlu1 %1361 }
  0xf7   : > { %1582 = vperm.xlu0 %2266, %v2477_v21   ;;  %2268 = vset.pattern.permute.xlu1 %v2338_v9  ;;  %v917_v9 = vmul.f32 %v914_v3, %v2531_v31  ;;  %v961_v21 = vrot.slane %v946_v14, %v2559_v46  ;;  %v966_v31 = vmul.f32 %v957_v61, %v937_v44 }
  0xf8   : > { %1962 = vperm.xlu1 %2268, %v2179_v45   ;;  %v2813_v3 = vrot.slane %v1749_v50, %v2559_v46 }
  0xf9   : > { %v967_v37 = vmul.f32 %v961_v21, %v937_v44  ;;  %v2785_v44 = vrot.slane %v1049_v11, %v2441_v6  ;;  %v219_v21 = vsel %vm218_vm2, %v217_v51, %v2527_v29 }
  0xfa   : > { %v1138_v57 = vmul.f32 %v2813_v3, %v2731_v56 }
  0xfb   : > { %2013 = vperm.xlu0 %2266, %v2179_v45   ;;  %v1753_v45 = vrot.slane %v2455_v13, %v2587_v5  ;;  %v1064_v55 = vmul.f32 %v2785_v44, %v1043_v19 }
  0xfc   : > { %921 = vrot.lane.b32.xlu1 %v915_v25, %s2347_s22  ;;  %v2817_v25 = vpop.permute.xlu1 %1426 }
  0xfd   : > { %2269 = vset.pattern.permute.xlu1 %v2343_v24  ;;  %v2810_v20 = vrot.slane %v1753_v45, %v2559_v46 }
  0xff   : > { %925 = vrot.lane.b32.xlu0 %v917_v9, %s2347_s22  ;;  %v1139_v14 = vmul.f32 %v2810_v20, %v2731_v56  ;;  %v204_v9 = vld [vmem:[#allocation2 + $0x8] sm:$0xf]  ;;  %v222_v56 = vmul.f32 %v219_v21, %v2550_v41 }
 0x100   : > { %923 = vrot.lane.b32.xlu1 %v916_v60, %s2347_s22  ;;  %2270 = vset.pattern.permute.xlu0 %v2343_v24  ;;  %v1053_v24 = vrot.slane %v2455_v13, %v2548_v40  ;;  %v2826_v52 = vpop.permute.xlu1 %1531  ;;  %v223_v60 = vmul.f32 %v217_v51, %v204_v9 }
 0x101   : > { %v239_v63 = vrot.slane %v222_v56, %v2548_v40  ;;  %v272_v0 = vrot.slane %v222_v56, %v2444_v7  ;;  %v309_v18 = vrot.slane %v222_v56, %v2559_v46  ;;  %v313_v41 = vrot.slane %v222_v56, %v2587_v5 }
 0x102   : > { %v2782_v38 = vrot.slane %v1053_v24, %v2441_v6  ;;  %v280_v61 = vrot.slane %v223_v60, %v2444_v7  ;;  %v243_v62 = vrot.slane %v223_v60, %v2441_v6  ;;  %v317_v29 = vrot.slane %v223_v60, %v2559_v46 }
 0x103   : > { %974 = vrot.lane.b32.xlu0 %v967_v37, %s2347_s22  ;;  %v235_v37 = vrot.slane %v222_v56, %v2441_v6  ;;  %v254_v11 = vrot.slane %v239_v63, %v2441_v6  ;;  %v354_v17 = vrot.slane %v223_v60, %v2590_v8  ;;  %v346_v50 = vrot.slane %v222_v56, %v2590_v8 }
 0x104   : > { %972 = vrot.lane.b32.xlu1 %v966_v31, %s2347_s22  ;;  %v1065_v49 = vmul.f32 %v2782_v38, %v1043_v19  ;;  %v2830_v59 = vpop.permute.xlu1 %1638  ;;  %v276_v31 = vrot.slane %v222_v56, %v2570_v53  ;;  %v258_v24 = vrot.slane %v243_v62, %v2441_v6 }
 0x105   : > { %v250_v2 = vrot.slane %v235_v37, %v2441_v6  ;;  %v260_v19 = vmul.f32 %v254_v11, %v2561_v47  ;;  %v369_v37 = vrot.slane %v354_v17, %v2590_v8 }
 0x106   : > { %v291_v15 = vrot.slane %v276_v31, %v2444_v7  ;;  %v261_v16 = vmul.f32 %v258_v24, %v2561_v47 }
 0x107   : > { %1023 = vrot.lane.b32.xlu0 %v1017_v1, %s2347_s22  ;;  %v295_v1 = vrot.slane %v280_v61, %v2444_v7 }
 0x108   : > { %976 = vrot.lane.b32.xlu1 %v968_v4, %s2347_s22  ;;  %v2839_v10 = vpop.permute.xlu1 %1692  ;;  %v287_v4 = vrot.slane %v272_v0, %v2444_v7  ;;  %v297_v51 = vmul.f32 %v291_v15, %v2521_v26  ;;  %v361_v0 = vrot.slane %v346_v50, %v2590_v8 }
 0x10a   : > { %v300_v21 = vadd.f32 %v297_v51, %v260_v19 }
 0x10b   : > { %1027 = vrot.lane.b32.xlu0 %v1019_v35, %s2347_s22  ;;  %v259_v35 = vmul.f32 %v250_v2, %v2561_v47  ;;  %v370_v2 = vmul.f32 %v361_v0, %v2529_v30 }
 0x10c   : > { %1025 = vrot.lane.b32.xlu1 %v1018_v22, %s2347_s22  ;;  %s3249_s22 = scalar_lea.hbm %s3296_s4, %s2186_s10 }
 0x10f   : > { %1070 = vrot.lane.b32.xlu0 %v1065_v49, %s2339_s12  ;;  %v332_v49 = vrot.slane %v317_v29, %v2559_v46 }
 0x110   : > { %1068 = vrot.lane.b32.xlu1 %v1064_v55, %s2339_s12  ;;  %v350_v55 = vrot.slane %v222_v56, %v2606_v42 }
 0x111   : > { %v335_v62 = vmul.f32 %v332_v49, %v2525_v28 }
 0x112   : > { %v365_v31 = vrot.slane %v350_v55, %v2590_v8 }
 0x113   : > { %1107 = vrot.lane.b32.xlu0 %v1102_v23, %s2339_s12  ;;  %v298_v23 = vmul.f32 %v295_v1, %v2521_v26  ;;  %v372_v1 = vmul.f32 %v369_v37, %v2529_v30 }
 0x114   : > { %1105 = vrot.lane.b32.xlu1 %v1101_v12, %s2339_s12  ;;  %v324_v12 = vrot.slane %v309_v18, %v2559_v46  ;;  %v371_v11 = vmul.f32 %v365_v31, %v2529_v30 }
 0x115   : > { %v301_v9 = vadd.f32 %v298_v23, %v261_v16 }
 0x116   : > { %v333_v56 = vmul.f32 %v324_v12, %v2525_v28 }
 0x117   : > { %1144 = vrot.lane.b32.xlu0 %v1139_v14, %s2339_s12  ;;  %v328_v14 = vrot.slane %v313_v41, %v2559_v46  ;;  %v338_v29 = vadd.f32 %v335_v62, %v301_v9 }
 0x118   : > { %1142 = vrot.lane.b32.xlu1 %v1138_v57, %s2339_s12  ;;  %v296_v57 = vmul.f32 %v287_v4, %v2521_v26 }
 0x119   : > { %v334_v63 = vmul.f32 %v328_v14, %v2525_v28  ;;  %v375_v15 = vadd.f32 %v372_v1, %v338_v29 }
 0x11a   : > { %v299_v47 = vadd.f32 %v296_v57, %v259_v35 }
 0x11b   : > { %v337_v26 = vadd.f32 %v334_v63, %v300_v21 }
 0x11c   : > { %v336_v18 = vadd.f32 %v333_v56, %v299_v47 }
 0x11d   : > { %v374_v17 = vadd.f32 %v371_v11, %v337_v26 }
 0x11e   : > { %v373_v16 = vadd.f32 %v370_v2, %v336_v18 }
 0x129   : > { %v423_v22 = vpop.permute.xlu0 %422  ;;  %v421_v45 = vpop.permute.xlu1 %420 }
 0x12a   : > { %v427_v4 = vsel %vm426_vm1, %v421_v45, %v423_v22 }
 0x12b   : > { %v432_v23 = vadd.f32 %v427_v4, %v373_v16 }
 0x12d   : > { %v477_v60 = vpop.permute.xlu0 %476  ;;  %v425_v61 = vpop.permute.xlu1 %424 }
 0x12e   : > { %v428_v28 = vsel %vm426_vm1, %v423_v22, %v425_v61  ;;  %v434_v49 = vadd.f32 %v425_v61, %v375_v15 }
 0x12f   : > { %v433_v12 = vadd.f32 %v428_v28, %v374_v17 }
 0x130   : > { %v485_v9 = vadd.f32 %v477_v60, %v434_v49 }
 0x131   : > { %v524_v41 = vpop.permute.xlu0 %523  ;;  %v473_v24 = vpop.permute.xlu1 %472 }
 0x135   : > { %v528_v35 = vpop.permute.xlu0 %527  ;;  %v475_v19 = vpop.permute.xlu1 %474 }
 0x136   : > { %v478_v50 = vsel %vm426_vm1, %v473_v24, %v475_v19  ;;  %v479_v55 = vsel %vm426_vm1, %v475_v19, %v477_v60  ;;  %v536_v62 = vadd.f32 %v528_v35, %v485_v9 }
 0x137   : > { %v483_v14 = vadd.f32 %v478_v50, %v432_v23  ;;  %v484_v57 = vadd.f32 %v479_v55, %v433_v12 }
 0x139   : > { %v575_v51 = vpop.permute.xlu0 %574  ;;  %v526_v30 = vpop.permute.xlu1 %525 }
 0x13a   : > { %v529_v45 = vsel %vm426_vm1, %v524_v41, %v526_v30  ;;  %v530_v22 = vsel %vm426_vm1, %v526_v30, %v528_v35 }
 0x13b   : > { %v534_v47 = vadd.f32 %v529_v45, %v483_v14  ;;  %v535_v21 = vadd.f32 %v530_v22, %v484_v57 }
 0x13d   : > { %v579_v37 = vpop.permute.xlu0 %578  ;;  %v577_v61 = vpop.permute.xlu1 %576 }
 0x13e   : > { %v587_v56 = vadd.f32 %v579_v37, %v536_v62  ;;  %v580_v63 = vsel %vm426_vm1, %v575_v51, %v577_v61  ;;  %v581_v0 = vsel %vm426_vm1, %v577_v61, %v579_v37 }
 0x13f   : > { %v585_v31 = vadd.f32 %v580_v63, %v534_v47  ;;  %v586_v29 = vadd.f32 %v581_v0, %v535_v21  ;;  %v1194_v0 = vrot.slane %v2743_v58, 4 }
 0x141   : > { %v654_v18 = vpop.permute.xlu0 %653  ;;  %v874_v26 = vpop.permute.xlu1 %873 }
 0x142   : > { %v663_v24 = vadd.f32 %v654_v18, %v587_v56 }
 0x145   : > { %v706_v60 = vpop.permute.xlu0 %705  ;;  %v650_v1 = vpop.permute.xlu1 %649 }
 0x146   : > { %v714_v41 = vadd.f32 %v706_v60, %v663_v24 }
 0x149   : > { %v757_v2 = vpop.permute.xlu0 %756  ;;  %v652_v11 = vpop.permute.xlu1 %651 }
 0x14a   : > { %v765_v4 = vadd.f32 %v757_v2, %v714_v41  ;;  %v656_v15 = vsel %vm655_vm3, %v650_v1, %v652_v11  ;;  %v657_v28 = vsel %vm655_vm3, %v652_v11, %v654_v18  ;;  %v1804_v1 = vrot.slane %v2455_v13, %v2606_v42 }
 0x14b   : > { %v661_v16 = vadd.f32 %v656_v15, %v585_v31  ;;  %v662_v17 = vadd.f32 %v657_v28, %v586_v29  ;;  %v1196_v29 = vsel %vm1195_vm4, %v1194_v0, %v2743_v58 }
 0x14c   : > { %v2900_v41 = vmul.f32 %v1196_v29, %v2455_v13 }
 0x14d   : > { %v808_v35 = vpop.permute.xlu0 %807  ;;  %v704_v19 = vpop.permute.xlu1 %703 }
 0x14e   : > { %v816_v49 = vadd.f32 %v808_v35, %v765_v4  ;;  %v708_v50 = vsel %vm655_vm3, %v704_v19, %v706_v60  ;;  %v1800_v60 = vrot.slane %v2455_v13, %v2590_v8  ;;  %v1217_v58 = vrot.slane %v2900_v41, %v2548_v40 }
 0x14f   : > { %v713_v55 = vadd.f32 %v708_v50, %v662_v17  ;;  %v1213_v15 = vrot.slane %v2900_v41, %v2441_v6 }
 0x150   : > { %v2882_v23 = vadd.f32 %v874_v26, %v816_v49  ;;  %v2909_v28 = vrot.slane %v1800_v60, %v2590_v8 }
 0x151   : > { %v702_v12 = vpop.permute.xlu0 %701  ;;  %v755_v14 = vpop.permute.xlu1 %754 }
 0x152   : > { %v707_v57 = vsel %vm655_vm3, %v702_v12, %v704_v19  ;;  %v759_v51 = vsel %vm655_vm3, %v755_v14, %v757_v2  ;;  %v1191_v2 = vld [vmem:[#allocation2 + $0xc] sm:$0xf] }
 0x153   : > { %v712_v30 = vadd.f32 %v707_v57, %v661_v16  ;;  %v764_v9 = vadd.f32 %v759_v51, %v713_v55  ;;  %v2912_v16 = vrot.slane %v1804_v1, %v2590_v8  ;;  %v2916_v19 = vmul.f32 %v1194_v0, %v1191_v2 }
 0x154   : > { %v1265_v57 = vrot.slane %v2900_v41, %v2444_v7 }
 0x155   : > { %v753_v45 = vpop.permute.xlu0 %752  ;;  %v806_v22 = vpop.permute.xlu1 %805  ;;  %v1221_v55 = vrot.slane %v2916_v19, %v2441_v6 }
 0x156   : > { %v758_v47 = vsel %vm655_vm3, %v753_v45, %v755_v14  ;;  %v810_v21 = vsel %vm655_vm3, %v806_v22, %v808_v35 }
 0x157   : > { %v763_v62 = vadd.f32 %v758_v47, %v712_v30  ;;  %v815_v37 = vadd.f32 %v810_v21, %v764_v9  ;;  %v1232_v9 = vrot.slane %v1217_v58, %v2441_v6  ;;  %v1269_v47 = vrot.slane %v2900_v41, %v2570_v53 }
 0x158   : > { %v1236_v21 = vrot.slane %v1221_v55, %v2441_v6  ;;  %v1415_v58 = vrot.slane %v2537_v34, 4 }
 0x159   : > { %v804_v61 = vpop.permute.xlu0 %803  ;;  %v870_v31 = vpop.permute.xlu1 %869  ;;  %v1284_v2 = vrot.slane %v1269_v47, %v2444_v7 }
 0x15a   : > { %v809_v56 = vsel %vm655_vm3, %v804_v61, %v806_v22  ;;  %v1273_v22 = vrot.slane %v2916_v19, %v2444_v7  ;;  %v1239_v29 = vmul.f32 %v1236_v21, %v2757_v27 }
 0x15b   : > { %v814_v63 = vadd.f32 %v809_v56, %v763_v62  ;;  %v1280_v56 = vrot.slane %v1265_v57, %v2444_v7  ;;  %v1290_v57 = vmul.f32 %v1284_v2, %v2535_v33 }
 0x15d   : > { %v1289_v1 = vmul.f32 %v1280_v56, %v2535_v33 }
 0x16a   : > { %v2891_v18 = vpop.permute.xlu0 %1857  ;;  %v2893_v24 = vpop.permute.xlu1 %1794 }
 0x16e   : > { %v872_v11 = vpop.permute.xlu0 %871  ;;  %v2902_v4 = vpop.permute.xlu1 %1844 }
 0x16f   : > { %v876_v17 = vsel %vm875_vm5, %v870_v31, %v872_v11  ;;  %v877_v35 = vsel %vm875_vm5, %v872_v11, %v874_v26  ;;  %v1228_v26 = vrot.slane %v1213_v15, %v2441_v6  ;;  %v1288_v31 = vrot.slane %v1273_v22, %v2444_v7 }
 0x170   : > { %v881_v49 = vadd.f32 %v876_v17, %v814_v63  ;;  %v882_v50 = vadd.f32 %v877_v35, %v815_v37  ;;  %v1238_v37 = vmul.f32 %v1232_v9, %v2757_v27  ;;  %v1316_v63 = vrot.slane %v2900_v41, %v2559_v46 }
 0x171   : > { %v1237_v61 = vmul.f32 %v1228_v26, %v2757_v27  ;;  %v1320_v11 = vrot.slane %v2900_v41, %v2587_v5  ;;  %v1324_v15 = vrot.slane %v2916_v19, %v2559_v46  ;;  %v1291_v35 = vmul.f32 %v1288_v31, %v2535_v33 }
 0x172   : > { %v1155_v12 = vpop.permute.xlu0 %1154  ;;  %v2920_v14 = vpop.permute.xlu1 %1911  ;;  %v1331_v27 = vrot.slane %v1316_v63, %v2559_v46  ;;  %v1417_v22 = vsel %vm1416_vm6, %v1415_v58, %v2537_v34  ;;  %v1371_v33 = vrot.slane %v2900_v41, %v2606_v42  ;;  %v1375_v34 = vrot.slane %v2916_v19, %v2590_v8 }
 0x173   : > { %v1175_v51 = vmul.f32 %v2909_v28, %v1155_v12  ;;  %v1176_v30 = vmul.f32 %v2912_v16, %v1155_v12 }
 0x174   : > { %v1386_v2 = vrot.slane %v1371_v33, %v2590_v8  ;;  %v1390_v19 = vrot.slane %v1375_v34, %v2590_v8 }
 0x175   : > { %1181 = vrot.lane.b32.xlu0 %v1176_v30, %s2339_s12  ;;  %1179 = vrot.lane.b32.xlu1 %v1175_v51, %s2339_s12  ;;  %v1335_v51 = vrot.slane %v1320_v11, %v2559_v46  ;;  %v1367_v30 = vrot.slane %v2900_v41, %v2590_v8  ;;  %s2350_s12 = smov 96  }
 0x176   : > { %v2930_v45 = vpop.permute.xlu0 %1582 }
 0x177   : > { %v2937_v62 = vpop.permute.xlu1 %1962  ;;  %v1341_v63 = vmul.f32 %v1335_v51, %v2775_v32  ;;  %v1382_v31 = vrot.slane %v1367_v30, %v2590_v8  ;;  %v1392_v51 = vmul.f32 %v1386_v2, %v2798_v54 }
 0x179   : > { %1245 = vrot.lane.b32.xlu0 %v1238_v37, %s2349_s29  ;;  %1243 = vrot.lane.b32.xlu1 %v1237_v61, %s2349_s29  ;;  %v1340_v61 = vmul.f32 %v1331_v27, %v2775_v32 }
 0x17a   : > { %v2946_v0 = vpop.permute.xlu0 %2013 }
 0x17b   : > { %v922_v60 = vpop.permute.xlu1 %921 }
 0x17d   : > { %1295 = vrot.lane.b32.xlu0 %v1289_v1, %s2349_s29  ;;  %1247 = vrot.lane.b32.xlu1 %v1239_v29, %s2349_s29  ;;  %v1412_v29 = vld [vmem:[#allocation2 + $0xc] sm:$0xf] }
 0x17e   : > { %v926_v17 = vpop.permute.xlu0 %925 }
 0x17f   : > { %v934_v55 = vadd.f32 %v926_v17, %v2882_v23  ;;  %v924_v12 = vpop.permute.xlu1 %923  ;;  %v1339_v23 = vrot.slane %v1324_v15, %v2559_v46  ;;  %v1391_v15 = vmul.f32 %v1382_v31, %v2798_v54 }
 0x180   : > { %v927_v9 = vsel %vm875_vm5, %v922_v60, %v924_v12  ;;  %v928_v26 = vsel %vm875_vm5, %v924_v12, %v926_v17 }
 0x181   : > { %v932_v47 = vadd.f32 %v927_v9, %v881_v49  ;;  %v933_v21 = vadd.f32 %v928_v26, %v882_v50  ;;  %1299 = vrot.lane.b32.xlu0 %v1291_v35, %s2349_s29  ;;  %1297 = vrot.lane.b32.xlu1 %v1290_v57, %s2349_s29  ;;  %v2980_v49 = vmul.f32 %v1417_v22, %v2455_v13 }
 0x182   : > { %v975_v37 = vpop.permute.xlu0 %974  ;;  %v1342_v1 = vmul.f32 %v1339_v23, %v2775_v32  ;;  %v2989_v13 = vmul.f32 %v1415_v58, %v1412_v29  ;;  %v1393_v9 = vmul.f32 %v1390_v19, %v2798_v54 }
 0x183   : > { %v973_v56 = vpop.permute.xlu1 %972  ;;  %v1434_v27 = vrot.slane %v2980_v49, %v2441_v6  ;;  %v1438_v32 = vrot.slane %v2980_v49, %v2548_v40  ;;  %v1486_v26 = vrot.slane %v2980_v49, %v2444_v7 }
 0x184   : > { %v978_v50 = vsel %vm875_vm5, %v973_v56, %v975_v37  ;;  %v1494_v56 = vrot.slane %v2989_v13, %v2444_v7 }
 0x185   : > { %v983_v60 = vadd.f32 %v978_v50, %v932_v47  ;;  %1348 = vrot.lane.b32.xlu0 %v1341_v63, %s2349_s29  ;;  %1346 = vrot.lane.b32.xlu1 %v1340_v61, %s2349_s29  ;;  %v1449_v22 = vrot.slane %v1434_v27, %v2441_v6  ;;  %v1453_v54 = vrot.slane %v1438_v32, %v2441_v6 }
 0x186   : > { %v1024_v41 = vpop.permute.xlu0 %1023  ;;  %v1501_v29 = vrot.slane %v1486_v26, %v2444_v7 }
 0x187   : > { %v977_v11 = vpop.permute.xlu1 %976  ;;  %v1458_v63 = vmul.f32 %v1449_v22, %v2817_v25  ;;  %v1459_v50 = vmul.f32 %v1453_v54, %v2817_v25  ;;  %v1545_v22 = vrot.slane %v2989_v13, %v2559_v46 }
 0x188   : > { %v979_v17 = vsel %vm875_vm5, %v975_v37, %v977_v11  ;;  %v985_v35 = vadd.f32 %v977_v11, %v934_v55  ;;  %v1442_v55 = vrot.slane %v2989_v13, %v2441_v6  ;;  %v1490_v37 = vrot.slane %v2980_v49, %v2570_v53 }
 0x189   : > { %v984_v12 = vadd.f32 %v979_v17, %v933_v21  ;;  %1397 = vrot.lane.b32.xlu0 %v1391_v15, %s2349_s29  ;;  %1350 = vrot.lane.b32.xlu1 %v1342_v1, %s2349_s29 }
 0x18a   : > { %v1028_v57 = vpop.permute.xlu0 %1027  ;;  %v1457_v1 = vrot.slane %v1442_v55, %v2441_v6  ;;  %v1505_v11 = vrot.slane %v1490_v37, %v2444_v7 }
 0x18b   : > { %v1036_v30 = vadd.f32 %v1028_v57, %v985_v35  ;;  %v1026_v58 = vpop.permute.xlu1 %1025  ;;  %v1510_v35 = vmul.f32 %v1501_v29, %v2541_v36 }
 0x18c   : > { %v1029_v47 = vsel %vm875_vm5, %v1024_v41, %v1026_v58  ;;  %v1030_v21 = vsel %vm875_vm5, %v1026_v58, %v1028_v57  ;;  %v1460_v19 = vmul.f32 %v1457_v1, %v2817_v25  ;;  %v1541_v25 = vrot.slane %v2980_v49, %v2587_v5 }
 0x18d   : > { %v1034_v23 = vadd.f32 %v1029_v47, %v983_v60  ;;  %v1035_v33 = vadd.f32 %v1030_v21, %v984_v12  ;;  %1401 = vrot.lane.b32.xlu0 %v1393_v9, %s2349_s29  ;;  %1399 = vrot.lane.b32.xlu1 %v1392_v51, %s2349_s29  ;;  %v1509_v12 = vrot.slane %v1494_v56, %v2444_v7 }
 0x18e   : > { %v1071_v61 = vpop.permute.xlu0 %1070  ;;  %v1537_v51 = vrot.slane %v2980_v49, %v2559_v46  ;;  %v1511_v9 = vmul.f32 %v1505_v11, %v2541_v36  ;;  %v1588_v47 = vrot.slane %v2980_v49, %v2590_v8  ;;  %v1596_v56 = vrot.slane %v2989_v13, %v2590_v8  ;;  %v1633_v13 = vld [vmem:[#allocation2 + $0xc] sm:$0xf] }
 0x18f   : > { %v1078_v31 = vadd.f32 %v1071_v61, %v1036_v30  ;;  %v1069_v34 = vpop.permute.xlu1 %1068  ;;  %v1512_v55 = vmul.f32 %v1509_v12, %v2541_v36  ;;  %v1556_v36 = vrot.slane %v1541_v25, %v2559_v46  ;;  %v1670_v11 = vmul.f32 %v2830_v59, %v2785_v44 }
 0x190   : > { %v1072_v60 = vsel %vm218_vm2, %v1069_v34, %v1071_v61  ;;  %v1076_v41 = vadd.f32 %v1069_v34, %v1034_v23  ;;  %v1603_v34 = vrot.slane %v1588_v47, %v2590_v8  ;;  %v1846_v12 = vrot.slane %v2902_v4, 4 }
 0x191   : > { %v1077_v2 = vadd.f32 %v1072_v60, %v1035_v33  ;;  %1466 = vrot.lane.b32.xlu0 %v1459_v50, %s2350_s12  ;;  %1464 = vrot.lane.b32.xlu1 %v1458_v63, %s2350_s12  ;;  %v1552_v33 = vrot.slane %v1537_v51, %v2559_v46  ;;  %v1562_v61 = vmul.f32 %v1556_v36, %v2826_v52 }
 0x192   : > { %v1108_v15 = vpop.permute.xlu0 %1107  ;;  %v1560_v63 = vrot.slane %v1545_v22, %v2559_v46  ;;  %v1612_v29 = vmul.f32 %v1603_v34, %v2930_v45  ;;  %v1723_v44 = vmul.f32 %v2839_v10, %v2788_v43  ;;  %v1773_v51 = vmul.f32 %v2813_v3, %v2545_v39  ;;  %v2271_v43 = vld [vmem:[#allocation2 + $0x4] sm:$0xff] }
 0x193   : > { %v3023_v27 = vadd.f32 %v1108_v15, %v1078_v31  ;;  %v1106_v17 = vpop.permute.xlu1 %1105  ;;  %v1561_v37 = vmul.f32 %v1552_v33, %v2826_v52  ;;  %v1592_v31 = vrot.slane %v2980_v49, %v2606_v42  ;;  %v1654_v49 = vrot.slane %v1633_v13, %v2441_v6 }
 0x194   : > { %v1109_v32 = vsel %vm218_vm2, %v1106_v17, %v1108_v15  ;;  %v1113_v57 = vadd.f32 %v1106_v17, %v1076_v41  ;;  %v1563_v50 = vmul.f32 %v1560_v63, %v2826_v52  ;;  %v1611_v41 = vrot.slane %v1596_v56, %v2590_v8 }
 0x195   : > { %v1114_v30 = vadd.f32 %v1109_v32, %v1077_v2  ;;  %1516 = vrot.lane.b32.xlu0 %v1510_v35, %s2350_s12  ;;  %1468 = vrot.lane.b32.xlu1 %v1460_v19, %s2350_s12  ;;  %v1607_v60 = vrot.slane %v1592_v31, %v2590_v8  ;;  %v1669_v52 = vrot.slane %v1654_v49, %v2441_v6 }
 0x196   : > { %v3034_v58 = vpop.permute.xlu0 %1144  ;;  %v1614_v2 = vmul.f32 %v1611_v41, %v2930_v45  ;;  %v1671_v15 = vmul.f32 %v2830_v59, %v2782_v38  ;;  %v1706_v19 = vrot.slane %v1633_v13, %v2444_v7  ;;  %v1722_v35 = vmul.f32 %v2839_v10, %v2792_v48 }
 0x197   : > { %v1143_v26 = vpop.permute.xlu1 %1142  ;;  %v1613_v1 = vmul.f32 %v1607_v60, %v2930_v45  ;;  %v1672_v45 = vmul.f32 %v1669_v52, %v2830_v59  ;;  %v1757_v38 = vrot.slane %v1633_v13, %v2559_v46  ;;  %v1848_v59 = vsel %vm1847_vm7, %v1846_v12, %v2902_v4 }
 0x198   : > { %v1146_v21 = vsel %vm218_vm2, %v1143_v26, %v3034_v58  ;;  %v3044_v23 = vadd.f32 %v1143_v26, %v1113_v57  ;;  %v1721_v17 = vrot.slane %v1706_v19, %v2444_v7  ;;  %v1808_v57 = vrot.slane %v1633_v13, %v2590_v8 }
 0x199   : > { %v3047_v54 = vadd.f32 %v1146_v21, %v1114_v30  ;;  %1520 = vrot.lane.b32.xlu0 %v1512_v55, %s2350_s12  ;;  %1518 = vrot.lane.b32.xlu1 %v1511_v9, %s2350_s12  ;;  %v1772_v48 = vrot.slane %v1757_v38, %v2559_v46  ;;  %v1774_v30 = vmul.f32 %v2810_v20, %v2545_v39 }
 0x19a   : > { %v1724_v32 = vmul.f32 %v1721_v17, %v2839_v10  ;;  %v1851_v25 = vmul.f32 %v2271_v43, %v1848_v59  ;;  %v1823_v4 = vrot.slane %v1808_v57, %v2590_v8  ;;  %v1824_v9 = vmul.f32 %v2909_v28, %v2893_v24 }
 0x19b   : > { %v1775_v10 = vmul.f32 %v1772_v48, %v2545_v39  ;;  %v1852_v26 = vmul.f32 %v1846_v12, %v1633_v13  ;;  %v1825_v20 = vmul.f32 %v2912_v16, %v2893_v24  ;;  %v1152_v19 = vadd.f32 %v3034_v58, %v3023_v27 }
 0x19c   : > { %v1869_v55 = vrot.slane %v1851_v25, %v2548_v40  ;;  %v1865_v3 = vrot.slane %v1851_v25, %v2441_v6  ;;  %v1826_v22 = vmul.f32 %v1823_v4, %v2893_v24  ;;  %v1917_v39 = vrot.slane %v1851_v25, %v2444_v7 }
 0x19d   : > { %1569 = vrot.lane.b32.xlu0 %v1562_v61, %s2350_s12  ;;  %1567 = vrot.lane.b32.xlu1 %v1561_v37, %s2350_s12  ;;  %v1873_v21 = vrot.slane %v1852_v26, %v2441_v6  ;;  %v1921_v40 = vrot.slane %v1851_v25, %v2570_v53  ;;  %v1925_v33 = vrot.slane %v1852_v26, %v2444_v7 }
 0x19e   : > { %v1884_v47 = vrot.slane %v1869_v55, %v2441_v6  ;;  %v1880_v28 = vrot.slane %v1865_v3, %v2441_v6  ;;  %v1932_v16 = vrot.slane %v1917_v39, %v2444_v7  ;;  %v1968_v61 = vrot.slane %v1851_v25, %v2559_v46 }
 0x19f   : > { %v1888_v37 = vrot.slane %v1873_v21, %v2441_v6  ;;  %v1936_v56 = vrot.slane %v1921_v40, %v2444_v7  ;;  %v1940_v53 = vrot.slane %v1925_v33, %v2444_v7  ;;  %v1972_v6 = vrot.slane %v1851_v25, %v2587_v5 }
 0x1a0   : > { %v1890_v24 = vmul.f32 %v1884_v47, %v2891_v18  ;;  %v1889_v36 = vmul.f32 %v1880_v28, %v2891_v18  ;;  %v1941_v63 = vmul.f32 %v1932_v16, %v2920_v14  ;;  %v1983_v60 = vrot.slane %v1968_v61, %v2559_v46 }
 0x1a1   : > { %1618 = vrot.lane.b32.xlu0 %v1612_v29, %s2350_s12  ;;  %1571 = vrot.lane.b32.xlu1 %v1563_v50, %s2350_s12  ;;  %v1891_v31 = vmul.f32 %v1888_v37, %v2891_v18  ;;  %v1942_v34 = vmul.f32 %v1936_v56, %v2920_v14  ;;  %v1943_v50 = vmul.f32 %v1940_v53, %v2920_v14  ;;  %v2063_v18 = vld [vmem:[%s3294_s2] sm:$0xff] }
 0x1a2   : > { %v1976_v29 = vrot.slane %v1852_v26, %v2559_v46  ;;  %v1987_v7 = vrot.slane %v1972_v6, %v2559_v46  ;;  %v1992_v41 = vmul.f32 %v1983_v60, %v2937_v62  ;;  %v2019_v14 = vrot.slane %v1851_v25, %v2590_v8 }
 0x1a3   : > { %v2023_v13 = vrot.slane %v1851_v25, %v2606_v42 }
 0x1a4   : > { %v1991_v5 = vrot.slane %v1976_v29, %v2559_v46  ;;  %v1993_v49 = vmul.f32 %v1987_v7, %v2937_v62  ;;  %v2034_v52 = vrot.slane %v2019_v14, %v2590_v8 }
 0x1a5   : > { %1622 = vrot.lane.b32.xlu0 %v1614_v2, %s2350_s12  ;;  %1620 = vrot.lane.b32.xlu1 %v1613_v1, %s2350_s12  ;;  %v2027_v2 = vrot.slane %v1852_v26, %v2590_v8 }
 0x1a6   : > { %v1994_v1 = vmul.f32 %v1991_v5, %v2937_v62  ;;  %v2043_v42 = vmul.f32 %v2034_v52, %v2946_v0 }
 0x1a7   : > { %v2042_v46 = vrot.slane %v2027_v2, %v2590_v8 }
 0x1a9   : > { %1678 = vrot.lane.b32.xlu0 %v1671_v15, %s2351_s30  ;;  %1676 = vrot.lane.b32.xlu1 %v1670_v11, %s2351_s30  ;;  %v2038_v11 = vrot.slane %v2023_v13, %v2590_v8  ;;  %v2045_v62 = vmul.f32 %v2042_v46, %v2946_v0 }
 0x1ab   : > { %v2044_v15 = vmul.f32 %v2038_v11, %v2946_v0 }
 0x1ad   : > { %1728 = vrot.lane.b32.xlu0 %v1722_v35, %s2351_s30  ;;  %1680 = vrot.lane.b32.xlu1 %v1672_v45, %s2351_s30 }
 0x1b1   : > { %1732 = vrot.lane.b32.xlu0 %v1724_v32, %s2351_s30  ;;  %1730 = vrot.lane.b32.xlu1 %v1723_v44, %s2351_s30 }
 0x1b5   : > { %1781 = vrot.lane.b32.xlu0 %v1774_v30, %s2351_s30  ;;  %1779 = vrot.lane.b32.xlu1 %v1773_v51, %s2351_s30 }
 0x1b9   : > { %1783 = vrot.lane.b32.xlu1 %v1775_v10, %s2351_s30  ;;  %1830 = vrot.lane.b32.xlu0 %v1824_v9, %s2351_s30 }
 0x1bd   : > { %1832 = vrot.lane.b32.xlu1 %v1825_v20, %s2351_s30  ;;  %1834 = vrot.lane.b32.xlu0 %v1826_v22, %s2351_s30 }
 0x1c1   : > { %1897 = vrot.lane.b32.xlu0 %v1890_v24, %s2352_s5  ;;  %1895 = vrot.lane.b32.xlu1 %v1889_v36, %s2352_s5 }
 0x1c5   : > { %1899 = vrot.lane.b32.xlu1 %v1891_v31, %s2352_s5  ;;  %1947 = vrot.lane.b32.xlu0 %v1941_v63, %s2352_s5 }
 0x1c9   : > { %1949 = vrot.lane.b32.xlu1 %v1942_v34, %s2352_s5  ;;  %1951 = vrot.lane.b32.xlu0 %v1943_v50, %s2352_s5 }
 0x1cd   : > { %2066 = vperm.xlu1 %2269, %v2063_v18   ;;  %1998 = vrot.lane.b32.xlu0 %v1992_v41, %s2352_s5 }
 0x1d1   : > { %2000 = vrot.lane.b32.xlu1 %v1993_v49, %s2352_s5  ;;  %2002 = vrot.lane.b32.xlu0 %v1994_v1, %s2352_s5 }
 0x1d5   : > { %2049 = vrot.lane.b32.xlu1 %v2043_v42, %s2352_s5  ;;  %2051 = vrot.lane.b32.xlu0 %v2044_v15, %s2352_s5 }
 0x1d9   : > { %2053 = vrot.lane.b32.xlu1 %v2045_v62, %s2352_s5 }
 0x1e7   : > { %v1182_v45 = vpop.permute.xlu0 %1181  ;;  %v1180_v17 = vpop.permute.xlu1 %1179 }
 0x1e8   : > { %v1189_v35 = vadd.f32 %v1182_v45, %v1152_v19  ;;  %v1183_v8 = vsel %vm218_vm2, %v1180_v17, %v1182_v45  ;;  %v1187_v12 = vadd.f32 %v1180_v17, %v3044_v23 }
 0x1e9   : > { %v1188_v38 = vadd.f32 %v1183_v8, %v3047_v54 }
 0x1eb   : > { %v1246_v44 = vpop.permute.xlu0 %1245  ;;  %v1244_v32 = vpop.permute.xlu1 %1243 }
 0x1ec   : > { %v1250_v6 = vsel %vm1249_vm8, %v1244_v32, %v1246_v44  ;;  %v1255_v29 = vadd.f32 %v1244_v32, %v1187_v12 }
 0x1ed   : > { %v1256_v7 = vadd.f32 %v1250_v6, %v1188_v38 }
 0x1ef   : > { %v1296_v59 = vpop.permute.xlu0 %1295  ;;  %v1248_v48 = vpop.permute.xlu1 %1247 }
 0x1f0   : > { %v1251_v0 = vsel %vm1249_vm8, %v1246_v44, %v1248_v48  ;;  %v1306_v18 = vadd.f32 %v1296_v59, %v1255_v29 }
 0x1f1   : > { %v1257_v57 = vadd.f32 %v1251_v0, %v1189_v35 }
 0x1f3   : > { %v1300_v51 = vpop.permute.xlu0 %1299  ;;  %v1298_v30 = vpop.permute.xlu1 %1297 }
 0x1f4   : > { %v1301_v60 = vsel %vm1249_vm8, %v1296_v59, %v1298_v30  ;;  %v1302_v14 = vsel %vm1249_vm8, %v1298_v30, %v1300_v51 }
 0x1f5   : > { %v1307_v41 = vadd.f32 %v1301_v60, %v1256_v7  ;;  %v1308_v15 = vadd.f32 %v1302_v14, %v1257_v57 }
 0x1f7   : > { %v1349_v27 = vpop.permute.xlu0 %1348  ;;  %v1347_v58 = vpop.permute.xlu1 %1346 }
 0x1f8   : > { %v1352_v5 = vsel %vm1249_vm8, %v1347_v58, %v1349_v27  ;;  %v1357_v13 = vadd.f32 %v1347_v58, %v1306_v18 }
 0x1f9   : > { %v1358_v1 = vadd.f32 %v1352_v5, %v1307_v41 }
 0x1fb   : > { %v1398_v43 = vpop.permute.xlu0 %1397  ;;  %v1351_v25 = vpop.permute.xlu1 %1350 }
 0x1fc   : > { %v1408_v11 = vadd.f32 %v1398_v43, %v1357_v13  ;;  %v1353_v46 = vsel %vm1249_vm8, %v1349_v27, %v1351_v25 }
 0x1fd   : > { %v1359_v35 = vadd.f32 %v1353_v46, %v1308_v15 }
 0x1ff   : > { %v1402_v10 = vpop.permute.xlu0 %1401  ;;  %v1400_v4 = vpop.permute.xlu1 %1399 }
 0x200   : > { %v1403_v49 = vsel %vm1249_vm8, %v1398_v43, %v1400_v4  ;;  %v1404_v19 = vsel %vm1249_vm8, %v1400_v4, %v1402_v10 }
 0x201   : > { %v1409_v62 = vadd.f32 %v1403_v49, %v1358_v1  ;;  %v1410_v32 = vadd.f32 %v1404_v19, %v1359_v35 }
 0x203   : > { %v1467_v9 = vpop.permute.xlu0 %1466  ;;  %v1465_v23 = vpop.permute.xlu1 %1464 }
 0x204   : > { %v1471_v42 = vsel %vm1470_vm9, %v1465_v23, %v1467_v9  ;;  %v1476_v45 = vadd.f32 %v1465_v23, %v1408_v11 }
 0x205   : > { %v1477_v8 = vadd.f32 %v1471_v42, %v1409_v62 }
 0x207   : > { %v1517_v26 = vpop.permute.xlu0 %1516  ;;  %v1469_v54 = vpop.permute.xlu1 %1468 }
 0x208   : > { %v1527_v12 = vadd.f32 %v1517_v26, %v1476_v45  ;;  %v1472_v38 = vsel %vm1470_vm9, %v1467_v9, %v1469_v54 }
 0x209   : > { %v1478_v27 = vadd.f32 %v1472_v38, %v1410_v32 }
 0x20b   : > { %v1521_v55 = vpop.permute.xlu0 %1520  ;;  %v1519_v3 = vpop.permute.xlu1 %1518 }
 0x20c   : > { %v1522_v17 = vsel %vm1470_vm9, %v1517_v26, %v1519_v3  ;;  %v1523_v57 = vsel %vm1470_vm9, %v1519_v3, %v1521_v55 }
 0x20d   : > { %v1528_v59 = vadd.f32 %v1522_v17, %v1477_v8  ;;  %v1529_v4 = vadd.f32 %v1523_v57, %v1478_v27 }
 0x20f   : > { %v1570_v20 = vpop.permute.xlu0 %1569  ;;  %v1568_v22 = vpop.permute.xlu1 %1567 }
 0x210   : > { %v1573_v44 = vsel %vm1470_vm9, %v1568_v22, %v1570_v20  ;;  %v1578_v51 = vadd.f32 %v1568_v22, %v1527_v12 }
 0x211   : > { %v1579_v58 = vadd.f32 %v1573_v44, %v1528_v59 }
 0x213   : > { %v1619_v39 = vpop.permute.xlu0 %1618  ;;  %v1572_v47 = vpop.permute.xlu1 %1571 }
 0x214   : > { %v1629_v43 = vadd.f32 %v1619_v39, %v1578_v51  ;;  %v1574_v25 = vsel %vm1470_vm9, %v1570_v20, %v1572_v47 }
 0x215   : > { %v1580_v55 = vadd.f32 %v1574_v25, %v1529_v4 }
 0x217   : > { %v1623_v28 = vpop.permute.xlu0 %1622  ;;  %v1621_v21 = vpop.permute.xlu1 %1620 }
 0x218   : > { %v1624_v30 = vsel %vm1470_vm9, %v1619_v39, %v1621_v21  ;;  %v1625_v23 = vsel %vm1470_vm9, %v1621_v21, %v1623_v28 }
 0x219   : > { %v1630_v9 = vadd.f32 %v1624_v30, %v1579_v58  ;;  %v1631_v47 = vadd.f32 %v1625_v23, %v1580_v55 }
 0x21b   : > { %v3172_v40 = vpop.permute.xlu0 %1678  ;;  %v1677_v33 = vpop.permute.xlu1 %1676 }
 0x21c   : > { %v1683_v10 = vsel %vm1682_vm10, %v1677_v33, %v3172_v40  ;;  %v1688_v26 = vadd.f32 %v1677_v33, %v1629_v43 }
 0x21d   : > { %v1689_v3 = vadd.f32 %v1683_v10, %v1630_v9 }
 0x21f   : > { %v1729_v16 = vpop.permute.xlu0 %1728  ;;  %v1681_v24 = vpop.permute.xlu1 %1680 }
 0x220   : > { %v1739_v29 = vadd.f32 %v1729_v16, %v1688_v26  ;;  %v1684_v39 = vsel %vm1682_vm10, %v3172_v40, %v1681_v24 }
 0x223   : > { %v3174_v36 = vpop.permute.xlu0 %1732  ;;  %v3176_v37 = vpop.permute.xlu1 %1730 }
 0x224   : > { %v1734_v54 = vsel %vm1682_vm10, %v1729_v16, %v3176_v37  ;;  %v1735_v28 = vsel %vm1682_vm10, %v3176_v37, %v3174_v36  ;;  %v1690_v16 = vadd.f32 %v1684_v39, %v1631_v47 }
 0x225   : > { %v1740_v60 = vadd.f32 %v1734_v54, %v1689_v3 }
 0x226   : > { %v1741_v41 = vadd.f32 %v1735_v28, %v1690_v16 }
 0x227   : > { %v3178_v61 = vpop.permute.xlu0 %1781  ;;  %v3180_v56 = vpop.permute.xlu1 %1779 }
 0x228   : > { %v1785_v20 = vsel %vm1682_vm10, %v3180_v56, %v3178_v61  ;;  %v1790_v21 = vadd.f32 %v3180_v56, %v1739_v29 }
 0x229   : > { %v1791_v7 = vadd.f32 %v1785_v20, %v1740_v60 }
 0x22b   : > { %v3182_v53 = vpop.permute.xlu0 %1830  ;;  %v3184_v63 = vpop.permute.xlu1 %1783 }
 0x22c   : > { %v1841_v24 = vadd.f32 %v3182_v53, %v1790_v21  ;;  %v1786_v18 = vsel %vm1682_vm10, %v3178_v61, %v3184_v63 }
 0x22d   : > { %v1792_v49 = vadd.f32 %v1786_v18, %v1741_v41 }
 0x22f   : > { %v3186_v31 = vpop.permute.xlu0 %1834  ;;  %v3189_v34 = vpop.permute.xlu1 %1832 }
 0x230   : > { %v1836_v33 = vsel %vm1682_vm10, %v3182_v53, %v3189_v34  ;;  %v1837_v56 = vsel %vm1682_vm10, %v3189_v34, %v3186_v31 }
 0x231   : > { %v1842_v36 = vadd.f32 %v1836_v33, %v1791_v7  ;;  %v1843_v46 = vadd.f32 %v1837_v56, %v1792_v49 }
 0x233   : > { %v3191_v50 = vpop.permute.xlu0 %1897  ;;  %v1896_v2 = vpop.permute.xlu1 %1895 }
 0x234   : > { %v1902_v5 = vsel %vm1901_vm11, %v1896_v2, %v3191_v50  ;;  %v1907_v14 = vadd.f32 %v1896_v2, %v1841_v24 }
 0x235   : > { %v1908_v1 = vadd.f32 %v1902_v5, %v1842_v36 }
 0x237   : > { %v1948_v52 = vpop.permute.xlu0 %1947  ;;  %v1900_v48 = vpop.permute.xlu1 %1899 }
 0x238   : > { %v1958_v11 = vadd.f32 %v1948_v52, %v1907_v14  ;;  %v1903_v61 = vsel %vm1901_vm11, %v3191_v50, %v1900_v48 }
 0x239   : > { %v1909_v19 = vadd.f32 %v1903_v61, %v1843_v46 }
 0x23b   : > { %v1952_v0 = vpop.permute.xlu0 %1951  ;;  %v1950_v22 = vpop.permute.xlu1 %1949 }
 0x23c   : > { %v1953_v13 = vsel %vm1901_vm11, %v1948_v52, %v1950_v22  ;;  %v1954_v15 = vsel %vm1901_vm11, %v1950_v22, %v1952_v0 }
 0x23d   : > { %v1959_v42 = vadd.f32 %v1953_v13, %v1908_v1  ;;  %v1960_v52 = vadd.f32 %v1954_v15, %v1909_v19 }
 0x23f   : > { %v1999_v6 = vpop.permute.xlu0 %1998 }
 0x240   : > { %v2009_v62 = vadd.f32 %v1999_v6, %v1958_v11 }
 0x243   : > { %v2003_v37 = vpop.permute.xlu0 %2002 }
 0x247   : > { %v2052_v45 = vpop.permute.xlu0 %2051 }
 0x24c   : > { %v2067_v40 = vpop.permute.xlu1 %2066 }
 0x250   : > { %v2001_v53 = vpop.permute.xlu1 %2000 }
 0x251   : > { %v2004_v63 = vsel %vm1901_vm11, %v1999_v6, %v2001_v53  ;;  %v2005_v2 = vsel %vm1901_vm11, %v2001_v53, %v2003_v37 }
 0x252   : > { %v2010_v31 = vadd.f32 %v2004_v63, %v1959_v42  ;;  %v2011_v12 = vadd.f32 %v2005_v2, %v1960_v52 }
 0x254   : > { %v2050_v34 = vpop.permute.xlu1 %2049 }
 0x255   : > { %v2055_v17 = vsel %vm1901_vm11, %v2050_v34, %v2052_v45  ;;  %v2060_v35 = vadd.f32 %v2050_v34, %v2009_v62 }
 0x256   : > { %v2061_v8 = vadd.f32 %v2055_v17, %v2010_v31 }
 0x257   : > { %v2069_v50 = vadd.f32 %v2067_v40, %v2060_v35 }
 0x258   : > { %v2070_v38 = vadd.f32 %v2067_v40, %v2061_v8  ;;  %v2054_v44 = vpop.permute.xlu1 %2053 }
 0x259   : > { %v2072_v32 = vmax.f32 %v2069_v50, 0.0  ;;  %v2056_v59 = vsel %vm1901_vm11, %v2052_v45, %v2054_v44 }
 0x25a   : > { %v2073_v48 = vmax.f32 %v2070_v38, 0.0  ;;  %v2062_v0 = vadd.f32 %v2056_v59, %v2011_v12 }
 0x25b   : > { %2078 = vrot.lane.b32.xlu0 %v2072_v32, %s2348_s28 }
 0x25c   : > { %v2071_v57 = vadd.f32 %v2067_v40, %v2062_v0  ;;  %2080 = vrot.lane.b32.xlu1 %v2073_v48, %s2348_s28 }
 0x25e   : > { %v2074_v51 = vmax.f32 %v2071_v57, 0.0 }
 0x260   : > { %2082 = vrot.lane.b32.xlu0 %v2074_v51, %s2348_s28  ;;  %s2276_s28 = sshll.u32 %s2353_s19, 4  ;;  %s2277_s28 = int_to_ptr.vmem [resolvable:$false] %s2276_s28 }
 0x261   : > { %s2278_s29 = scalar_lea.vmem %s2277_s28, 512  ;;  %p2279_p0 = scmp.lt.s32.totalorder %s3251_s13, %s2277_s28 }
 0x262   : > { %p2280_p1 = scmp.lt.s32.totalorder %s2278_s29, %s2272_s27 }
 0x264   : > { %p2281_p2 = por %p2280_p1, %p2279_p0 }
 0x266   : > { %p2282_p3 = pnand %p2281_p2, %p2275_p13 }
 0x2cd   : > { %v2079_v30 = vpop.permute.xlu0 %2078 }
 0x2ce   : > { %v2081_v27 = vpop.permute.xlu1 %2080 }
 0x2cf   : > { %v2084_v58 = vsel %vm1847_vm7, %v2079_v30, %v2081_v27 }
 0x2d0   : > { %2088 = vst [vmem:[%s190_s11] sm:$0xff] %v2084_v58 }
 0x2d2   : > { %v2083_v43 = vpop.permute.xlu0 %2082 }
 0x2d3   : > { %v2085_v25 = vsel %vm1847_vm7, %v2081_v27, %v2083_v43 }
 0x2d4   : > { %2089 = vst [vmem:[%s190_s11 + $0x8] sm:$0xff] %v2085_v25 }
 0x2d5   : > { %2285 = shalt.err (!%p2282_p3)
}
 0x2d6   : > { %s2286_s12 = scalar_lea.hbm %s3249_s22, 256  ;;  %s2290_s6 = scalar_lea.hbm %s3296_s4, 512 }
 0x2d7   : > { %p2287_p4 = scmp.ne.s32.totalorder %s3249_s22, %s2286_s12  ;;  %p2291_p9 = scmp.lt.u32.totalorder %s3249_s22, %s3296_s4 }
 0x2d8   : > { %p2292_p10 = scmp.lt.u32.totalorder %s2290_s6, %s2286_s12  ;;  %p2294_p12 = scmp.lt.u32.totalorder %s2286_s12, %s3249_s22 }
 0x2d9   : > { %p2288_p7 = pnand %p2287_p4, %p2417_p5 }
 0x2da   : > { %p2293_p11 = por %p2292_p10, %p2291_p9 }
 0x2db   : > { %p2289_p8 = pneg %p2288_p7 }
 0x2dc   : > { %p2295_p13 = por %p2294_p12, %p2293_p11 }
 0x2de   : > { %p2296_p0 = pnand %p2295_p13, %p2289_p8 }
 0x2e0   : > { %2299 = shalt.err (!%p2296_p0)
}
 0x2e1   : > { %2187 = dma.vmem_to_hbm [thread:$0]  (%p2417_p5), %s3251_s13, 256, %s3249_s22, %s2091_s23  }
 0x2e2 PF: > { %p2193_p1 = scmp.ge.s32.totalorder %s2334_s18, 2  ;;  %s2117_s9 = sand.u32 1, %s2322_s15  }
 0x2e3   : > { %s2118_s10 = scalar_lea.sflag [#allocation4], %s2117_s9 }
 0x2e4   : > { %p2190_p2 = pnand %p2193_p1, %p2421_p6 }
 0x2e6   : > { %2317 = dma.done.wait (!%p2190_p2), %s2118_s10, 256  }
 0x2e7   : > { %2319 = vsyncadd (!%p2190_p2), %s2118_s10, 4294967040  ;;  %p14_p3 = scmp.ge.s32.totalorder %s2404_s21, 4   ;;  %s3299_s15 = smov %s2326_s16 }
 0x2e8   : > { %s3300_s16 = smov %s2330_s17  ;;  %s3301_s17 = smov %s2415_s24 }
 0x2e9   : > { %s3302_s18 = smov %s2404_s21  ;;  %16 = sbr.rel (!%p14_p3) target bundleno = 3 (0x3), region = 80 }
 0x2f0   :  { %2123 = vsyncpa [#allocation4], 1 }
 0x2f1   :  { %2125 = vsyncpa [#allocation4 + $0x1], 1 }

</bundles_post_ra>
